<compile_context>
chip_gen: v5e
topology: v5e:2x2
jax: 0.10.0
libtpu: 0.0.40
codegen_flags: <defaults>
</compile_context>

<pallas_src>
import jax
import jax.numpy as jnp
import numpy as np
from jax import lax
from jax.experimental import pallas as pl
from jax.experimental.pallas import tpu as pltpu

# ----------------------- model config (small, deterministic) -----------------------
NUM_NODES = 8
INPUT_DIM = 4
HIDDEN_DIM = 32
OUTPUT_DIM = 8
NUM_BLOCKS = 3
NUM_GCN = 1 + 2 * NUM_BLOCKS           # input projection + 2 convs per residual block = 7
FLAT = NUM_NODES * HIDDEN_DIM          # 256
F1 = FLAT // 4                         # 64
F2 = FLAT // 8                         # 32

# ----------------------------- kernel tiling constants ------------------------------
CHUNK = 16                             # graphs per kernel invocation
STACK = CHUNK * NUM_NODES              # 128 stacked node rows -> full MXU sublane tile
LANES = 128                            # lane-dense width for head weights and the output
NEG = -1.0e4                           # lin3 bias pad: exp(NEG - m) == 0 exactly in f32

# row offsets inside the packed 128-lane slab
OFF_A = 0                              # block-diag adjacency  [STACK, 128]
OFF_GSUM = OFF_A + STACK               # graph-sum matrix      [CHUNK, 128]
OFF_WL2 = OFF_GSUM + CHUNK             # lin2 (lane-padded)    [F1, 128]
OFF_WL3 = OFF_WL2 + F1                 # lin3 (lane-padded)    [F2, 128]
OFF_B = OFF_WL3 + F2                   # all biases            [NUM_GCN + 3, 128]
SLAB_ROWS = OFF_B + NUM_GCN + 3        # 250


# ----------------------------------- kernel ----------------------------------------
def resgcn_kernel(x_ref, wgcn_ref, wide_ref, slab_ref, o_ref):
    f32 = jnp.float32
    a = slab_ref[OFF_A:OFF_A + STACK, :]            # [128, 128] block-diag normalized adjacency
    h = x_ref[...]                                  # [128, 32]  16 graphs' node features

    def bias(i, width):
        return slab_ref[OFF_B + i:OFF_B + i + 1, :width]

    def gcn(v, layer):
        # H' = A_blk @ (H @ W_layer) + b_layer — both matmuls run 128-row MXU tiles.
        vw = jnp.dot(v, wgcn_ref[layer], preferred_element_type=f32)
        return jnp.dot(a, vw, preferred_element_type=f32) + bias(layer, HIDDEN_DIM)

    # input projection + relu
    h = jnp.maximum(gcn(h, 0), 0.0)

    # residual GCN blocks — unrolled: strict serial dependency chain on tiny data.
    for blk in range(NUM_BLOCKS):
        out = jnp.maximum(gcn(h, 1 + 2 * blk), 0.0)
        out = gcn(out, 2 + 2 * blk)
        h = jnp.maximum(out + h, 0.0)

    # ---- per-graph flatten(h_g) @ Wl1 as ONE wide matmul for all 16 graphs at once ----
    # wcat[k, n*F1+f] = Wl1[n*H+k, f], so z[m, n*F1+f] = h[m,:] . Wl1[n*H:(n+1)*H, f].
    # The precomputed 0/1 mask keeps only the n == (m % NUM_NODES) diagonal blocks; 7 static
    # lane-slice adds fold the 8 groups, and one [16,128]x[128,64] matmul sums rows per graph.
    wcat = wide_ref[:HIDDEN_DIM, :]                 # [32, 512]
    mask = wide_ref[HIDDEN_DIM:, :]                 # [128, 512] constant 0/1
    z = jnp.dot(h, wcat, preferred_element_type=f32) * mask
    folded = z[:, :F1]
    for n in range(1, NUM_NODES):
        folded = folded + z[:, n * F1:(n + 1) * F1]                     # [128, 64]

    gsum = slab_ref[OFF_GSUM:OFF_GSUM + CHUNK, :]                       # [16, 128]
    v = jnp.maximum(jnp.dot(gsum, folded, preferred_element_type=f32)
                    + bias(NUM_GCN, F1), 0.0)                           # [16, 64]

    # remaining MLP head
    wl2 = slab_ref[OFF_WL2:OFF_WL2 + F1, :F2]                           # [64, 32]
    v = jnp.maximum(jnp.dot(v, wl2, preferred_element_type=f32)
                    + bias(NUM_GCN + 1, F2), 0.0)                       # [16, 32]

    wl3 = slab_ref[OFF_WL3:OFF_WL3 + F2, :]                             # [32, 128] lane-padded
    logits = (jnp.dot(v, wl3, preferred_element_type=f32)
              + bias(NUM_GCN + 2, LANES))                               # [16, 128], pad = -1e4

    # softmax over the last axis (exact divide; padded lanes contribute exp(-1e4 - m) == 0)
    m = jnp.max(logits, axis=-1, keepdims=True)
    e = jnp.exp(logits - m)
    o_ref[...] = e / jnp.sum(e, axis=-1, keepdims=True)                 # lane-dense [16, 128]


# ------------------------- parameter packing (wrapper glue) -------------------------
def pack_inputs(a_hat, params):
    (w0, b0, wb, bb, wl1, bl1, wl2, bl2, wl3, bl3) = params
    f32 = jnp.float32

    # All 7 GCN weights in one [7, 32, 32] array. The input projection is zero-padded on its
    # rows; node features are zero-padded the same way, so the product is unchanged.
    w0p = jnp.zeros((HIDDEN_DIM, HIDDEN_DIM), f32).at[:INPUT_DIM, :].set(w0)
    wgcn = jnp.concatenate(
        [w0p[None], wb.reshape(2 * NUM_BLOCKS, HIDDEN_DIM, HIDDEN_DIM)], axis=0)

    # lin1 rearranged for the single wide matmul: wcat[k, n*F1+f] = wl1[n*H+k, f]
    wcat = jnp.transpose(wl1.reshape(NUM_NODES, HIDDEN_DIM, F1), (1, 0, 2)) \
              .reshape(HIDDEN_DIM, NUM_NODES * F1)                      # [32, 512]
    # precomputed diagonal-block mask: mask[m, c] = (c // F1 == m % NUM_NODES)
    m_idx = np.arange(STACK) % NUM_NODES
    c_idx = np.arange(NUM_NODES * F1) // F1
    mask = jnp.asarray((c_idx[None, :] == m_idx[:, None]).astype(np.float32))
    wide = jnp.concatenate([wcat, mask], axis=0)                        # [160, 512]

    # One 128-lane slab: block-diag adjacency, graph-sum matrix, padded lin2/lin3, all biases.
    a_blk = jnp.kron(jnp.eye(CHUNK, dtype=f32), a_hat)                  # [128, 128]
    gsum = jnp.asarray(np.kron(np.eye(CHUNK, dtype=np.float32),
                               np.ones((1, NUM_NODES), np.float32)))    # [16, 128]
    wl2_pad = jnp.zeros((F1, LANES), f32).at[:, :F2].set(wl2)           # [64, 128]
    wl3_pad = jnp.zeros((F2, LANES), f32).at[:, :OUTPUT_DIM].set(wl3)   # [32, 128]

    def bias_row(b, fill=0.0):
        return jnp.full((1, LANES), fill, f32).at[:, :b.shape[-1]].set(b.reshape(1, -1))

    bias_rows = [bias_row(b0)]
    for blk in range(NUM_BLOCKS):
        bias_rows += [bias_row(bb[blk, 0]), bias_row(bb[blk, 1])]
    bias_rows += [bias_row(bl1), bias_row(bl2), bias_row(bl3, fill=NEG)]
    slab = jnp.concatenate([a_blk, gsum, wl2_pad, wl3_pad] + bias_rows, axis=0)  # [250, 128]

    return wgcn, wide, slab


# ----------------------------------- wrapper ----------------------------------------
def resgcn_forward(a_hat, x, params):
    """x: [B, NUM_NODES, INPUT_DIM] — a batch of node-feature sets sharing one graph."""
    B = x.shape[0]
    n_chunks = (B + CHUNK - 1) // CHUNK
    Bp = n_chunks * CHUNK

    wgcn, wide, slab = pack_inputs(a_hat, params)

    # Batch folded into the sublane axis: [Bp*NUM_NODES, HIDDEN_DIM], feature-lane zero-padded.
    x_pad = jnp.zeros((Bp, NUM_NODES, HIDDEN_DIM), jnp.float32).at[:B, :, :INPUT_DIM].set(x)
    x_stk = x_pad.reshape(Bp * NUM_NODES, HIDDEN_DIM)

    def resident(shape):
        nd = len(shape)
        return pl.BlockSpec(shape, lambda g, nd=nd: (0,) * nd)   # fetched once across the grid

    out = pl.pallas_call(
        resgcn_kernel,
        out_shape=jax.ShapeDtypeStruct((Bp, LANES), jnp.float32),
        grid=(n_chunks,),
        in_specs=[
            pl.BlockSpec((STACK, HIDDEN_DIM), lambda g: (g, 0)),  # 16 graphs' stacked nodes
            resident(wgcn.shape),
            resident(wide.shape),
            resident(slab.shape),
        ],
        out_specs=pl.BlockSpec((CHUNK, LANES), lambda g: (g, 0)),  # lane-dense output slab
        compiler_params=pltpu.CompilerParams(
            dimension_semantics=("arbitrary",)),  # tiny chunk count: megacore split not worth it
    )(x_stk, wgcn, wide, slab)
    return out[:B, :OUTPUT_DIM]                                        # [B, OUTPUT_DIM]


# ------------------------- glue: normalized adjacency, params -----------------------
def gcn_normalized_adjacency(edge_index, num_nodes):
    """Dense A_hat = D^{-1/2}(A + I)D^{-1/2}, matching PyG GCNConv gcn_norm."""
    src, dst = edge_index[0], edge_index[1]
    A = jnp.zeros((num_nodes, num_nodes), jnp.float32).at[dst, src].add(1.0)
    A = A + jnp.eye(num_nodes, dtype=jnp.float32)
    deg = jnp.sum(A, axis=1)
    d_inv_sqrt = jnp.where(deg > 0, 1.0 / jnp.sqrt(deg), 0.0)
    return d_inv_sqrt[:, None] * A * d_inv_sqrt[None, :]


def init_params(key):
    ks = jax.random.split(key, 10)

    def w(k, shape, scale=0.1):
        return (scale * jax.random.normal(k, shape)).astype(jnp.float32)

    w0 = w(ks[0], (INPUT_DIM, HIDDEN_DIM))
    b0 = w(ks[1], (1, HIDDEN_DIM))
    wb = w(ks[2], (NUM_BLOCKS, 2, HIDDEN_DIM, HIDDEN_DIM))
    bb = w(ks[3], (NUM_BLOCKS, 2, 1, HIDDEN_DIM))
    wl1 = w(ks[4], (FLAT, F1))       # nn.Linear weights stored already transposed ([in, out])
    bl1 = w(ks[5], (1, F1))
    wl2 = w(ks[6], (F1, F2))
    bl2 = w(ks[7], (1, F2))
    wl3 = w(ks[8], (F2, OUTPUT_DIM))
    bl3 = w(ks[9], (1, OUTPUT_DIM))
    return (w0, b0, wb, bb, wl1, bl1, wl2, bl2, wl3, bl3)


def resgcn_reference(a_hat, x1, params):
    """Pure-JAX reference of the PyTorch forward for ONE graph (x1: [N, INPUT_DIM]), f32-exact."""
    (w0, b0, wb, bb, wl1, bl1, wl2, bl2, wl3, bl3) = params
    dot = lambda a, b: jnp.dot(a, b, precision=lax.Precision.HIGHEST)
    gcn = lambda h, W, b: dot(a_hat, dot(h, W)) + b
    h = jax.nn.relu(gcn(x1, w0, b0))
    for blk in range(NUM_BLOCKS):
        out = jax.nn.relu(gcn(h, wb[blk, 0], bb[blk, 0]))
        out = gcn(out, wb[blk, 1], bb[blk, 1])
        h = jax.nn.relu(out + h)
    v = h.reshape(1, -1)
    v = jax.nn.relu(dot(v, wl1) + bl1)
    v = jax.nn.relu(dot(v, wl2) + bl2)
    return jax.nn.softmax(dot(v, wl3) + bl3, axis=-1)


# -------------------------------------- main -----------------------------------------
if __name__ == "__main__":
    key = jax.random.PRNGKey(0)
    k_x, k_p = jax.random.split(key)

    BATCH = CHUNK  # 16 graphs -> one 128-row chunk: full MXU sublane tile, single grid step
    x = jax.random.normal(k_x, (BATCH, NUM_NODES, INPUT_DIM), dtype=jnp.float32)

    # deterministic bidirectional ring graph: edge_index [2, 2*N]
    nodes = np.arange(NUM_NODES)
    src = np.concatenate([nodes, (nodes + 1) % NUM_NODES])
    dst = np.concatenate([(nodes + 1) % NUM_NODES, nodes])
    edge_index = jnp.asarray(np.stack([src, dst]), dtype=jnp.int32)

    a_hat = gcn_normalized_adjacency(edge_index, NUM_NODES)
    params = init_params(k_p)

    out = jax.block_until_ready(resgcn_forward(a_hat, x, params))
    assert out.shape == (BATCH, OUTPUT_DIM)

    ref = jnp.concatenate([resgcn_reference(a_hat, x[b], params) for b in range(BATCH)],
                          axis=0)
    ref = jax.block_until_ready(ref)

    assert np.allclose(np.asarray(out), np.asarray(ref), atol=1e-5, rtol=1e-5)
    assert np.allclose(np.asarray(jnp.sum(out, axis=-1)), 1.0, atol=1e-4)  # softmax rows

    print("KERNEL_OK")
</pallas_src>

<mosaic_0001>
module attributes {stable_mosaic.version = 11 : i64} {
  func.func @resgcn_kernel(%arg0: i32, %arg1: memref<128x32xf32, #tpu.memory_space<vmem>>, %arg2: memref<7x32x32xf32, #tpu.memory_space<vmem>>, %arg3: memref<160x512xf32, #tpu.memory_space<vmem>>, %arg4: memref<250x128xf32, #tpu.memory_space<vmem>>, %arg5: memref<16x128xf32, #tpu.memory_space<vmem>>) attributes {dimension_semantics = [#tpu.dimension_semantics<arbitrary>], iteration_bounds = array<i64: 1>, scalar_prefetch = 0 : i64, scratch_operands = 0 : i64, tpu.core_type = #tpu.core_type<tc>, window_params = [{transform_indices = @transform_0, window_bounds = array<i64: 128, 32>}, {pipeline_mode = #tpu.pipeline_mode<synchronous>, transform_indices = @transform_1, window_bounds = array<i64: 7, 32, 32>}, {pipeline_mode = #tpu.pipeline_mode<synchronous>, transform_indices = @transform_2, window_bounds = array<i64: 160, 512>}, {pipeline_mode = #tpu.pipeline_mode<synchronous>, transform_indices = @transform_3, window_bounds = array<i64: 250, 128>}, {transform_indices = @transform_4, window_bounds = array<i64: 16, 128>}]} {
    %c0 = arith.constant 0 : index
    %c0_0 = arith.constant 0 : index
    %0 = vector.load %arg4[%c0, %c0_0] : memref<250x128xf32, #tpu.memory_space<vmem>>, vector<128x128xf32>
    %c0_1 = arith.constant 0 : index
    %c0_2 = arith.constant 0 : index
    %1 = vector.load %arg1[%c0_1, %c0_2] : memref<128x32xf32, #tpu.memory_space<vmem>>, vector<128x32xf32>
    %c0_3 = arith.constant 0 : index
    %c0_4 = arith.constant 0 : index
    %c0_5 = arith.constant 0 : index
    %2 = vector.load %arg2[%c0_3, %c0_4, %c0_5] : memref<7x32x32xf32, #tpu.memory_space<vmem>>, vector<1x32x32xf32>
    %3 = vector.shape_cast %2 : vector<1x32x32xf32> to vector<32x32xf32>
    %cst = arith.constant dense<0.000000e+00> : vector<128x32xf32>
    %4 = tpu.matmul %1, %3, %cst {dimension_numbers = #tpu.dot_dimension_numbers<[1], [0], [0], [1], [0, 0, 1, 1], [], []>} : vector<128x32xf32>, vector<32x32xf32>, vector<128x32xf32> -> vector<128x32xf32>
    %cst_6 = arith.constant dense<0.000000e+00> : vector<128x32xf32>
    %5 = tpu.matmul %0, %4, %cst_6 {dimension_numbers = #tpu.dot_dimension_numbers<[1], [0], [0], [1], [0, 0, 1, 1], [], []>} : vector<128x128xf32>, vector<128x32xf32>, vector<128x32xf32> -> vector<128x32xf32>
    %c240 = arith.constant 240 : index
    %c0_7 = arith.constant 0 : index
    %6 = vector.load %arg4[%c240, %c0_7] : memref<250x128xf32, #tpu.memory_space<vmem>>, vector<1x32xf32>
    %7 = vector.broadcast %6 : vector<1x32xf32> to vector<128x32xf32>
    %8 = arith.addf %5, %7 : vector<128x32xf32>
    %cst_8 = arith.constant 0.000000e+00 : f32
    %9 = vector.broadcast %cst_8 : f32 to vector<128x32xf32>
    %10 = arith.maximumf %8, %9 : vector<128x32xf32>
    %c1 = arith.constant 1 : index
    %c0_9 = arith.constant 0 : index
    %c0_10 = arith.constant 0 : index
    %11 = vector.load %arg2[%c1, %c0_9, %c0_10] : memref<7x32x32xf32, #tpu.memory_space<vmem>>, vector<1x32x32xf32>
    %12 = vector.shape_cast %11 : vector<1x32x32xf32> to vector<32x32xf32>
    %cst_11 = arith.constant dense<0.000000e+00> : vector<128x32xf32>
    %13 = tpu.matmul %10, %12, %cst_11 {dimension_numbers = #tpu.dot_dimension_numbers<[1], [0], [0], [1], [0, 0, 1, 1], [], []>} : vector<128x32xf32>, vector<32x32xf32>, vector<128x32xf32> -> vector<128x32xf32>
    %cst_12 = arith.constant dense<0.000000e+00> : vector<128x32xf32>
    %14 = tpu.matmul %0, %13, %cst_12 {dimension_numbers = #tpu.dot_dimension_numbers<[1], [0], [0], [1], [0, 0, 1, 1], [], []>} : vector<128x128xf32>, vector<128x32xf32>, vector<128x32xf32> -> vector<128x32xf32>
    %c241 = arith.constant 241 : index
    %c0_13 = arith.constant 0 : index
    %15 = vector.load %arg4[%c241, %c0_13] : memref<250x128xf32, #tpu.memory_space<vmem>>, vector<1x32xf32>
    %16 = vector.broadcast %15 : vector<1x32xf32> to vector<128x32xf32>
    %17 = arith.addf %14, %16 : vector<128x32xf32>
    %cst_14 = arith.constant 0.000000e+00 : f32
    %18 = vector.broadcast %cst_14 : f32 to vector<128x32xf32>
    %19 = arith.maximumf %17, %18 : vector<128x32xf32>
    %c2 = arith.constant 2 : index
    %c0_15 = arith.constant 0 : index
    %c0_16 = arith.constant 0 : index
    %20 = vector.load %arg2[%c2, %c0_15, %c0_16] : memref<7x32x32xf32, #tpu.memory_space<vmem>>, vector<1x32x32xf32>
    %21 = vector.shape_cast %20 : vector<1x32x32xf32> to vector<32x32xf32>
    %cst_17 = arith.constant dense<0.000000e+00> : vector<128x32xf32>
    %22 = tpu.matmul %19, %21, %cst_17 {dimension_numbers = #tpu.dot_dimension_numbers<[1], [0], [0], [1], [0, 0, 1, 1], [], []>} : vector<128x32xf32>, vector<32x32xf32>, vector<128x32xf32> -> vector<128x32xf32>
    %cst_18 = arith.constant dense<0.000000e+00> : vector<128x32xf32>
    %23 = tpu.matmul %0, %22, %cst_18 {dimension_numbers = #tpu.dot_dimension_numbers<[1], [0], [0], [1], [0, 0, 1, 1], [], []>} : vector<128x128xf32>, vector<128x32xf32>, vector<128x32xf32> -> vector<128x32xf32>
    %c242 = arith.constant 242 : index
    %c0_19 = arith.constant 0 : index
    %24 = vector.load %arg4[%c242, %c0_19] : memref<250x128xf32, #tpu.memory_space<vmem>>, vector<1x32xf32>
    %25 = vector.broadcast %24 : vector<1x32xf32> to vector<128x32xf32>
    %26 = arith.addf %23, %25 : vector<128x32xf32>
    %27 = arith.addf %26, %10 : vector<128x32xf32>
    %cst_20 = arith.constant 0.000000e+00 : f32
    %28 = vector.broadcast %cst_20 : f32 to vector<128x32xf32>
    %29 = arith.maximumf %27, %28 : vector<128x32xf32>
    %c3 = arith.constant 3 : index
    %c0_21 = arith.constant 0 : index
    %c0_22 = arith.constant 0 : index
    %30 = vector.load %arg2[%c3, %c0_21, %c0_22] : memref<7x32x32xf32, #tpu.memory_space<vmem>>, vector<1x32x32xf32>
    %31 = vector.shape_cast %30 : vector<1x32x32xf32> to vector<32x32xf32>
    %cst_23 = arith.constant dense<0.000000e+00> : vector<128x32xf32>
    %32 = tpu.matmul %29, %31, %cst_23 {dimension_numbers = #tpu.dot_dimension_numbers<[1], [0], [0], [1], [0, 0, 1, 1], [], []>} : vector<128x32xf32>, vector<32x32xf32>, vector<128x32xf32> -> vector<128x32xf32>
    %cst_24 = arith.constant dense<0.000000e+00> : vector<128x32xf32>
    %33 = tpu.matmul %0, %32, %cst_24 {dimension_numbers = #tpu.dot_dimension_numbers<[1], [0], [0], [1], [0, 0, 1, 1], [], []>} : vector<128x128xf32>, vector<128x32xf32>, vector<128x32xf32> -> vector<128x32xf32>
    %c243 = arith.constant 243 : index
    %c0_25 = arith.constant 0 : index
    %34 = vector.load %arg4[%c243, %c0_25] : memref<250x128xf32, #tpu.memory_space<vmem>>, vector<1x32xf32>
    %35 = vector.broadcast %34 : vector<1x32xf32> to vector<128x32xf32>
    %36 = arith.addf %33, %35 : vector<128x32xf32>
    %cst_26 = arith.constant 0.000000e+00 : f32
    %37 = vector.broadcast %cst_26 : f32 to vector<128x32xf32>
    %38 = arith.maximumf %36, %37 : vector<128x32xf32>
    %c4 = arith.constant 4 : index
    %c0_27 = arith.constant 0 : index
    %c0_28 = arith.constant 0 : index
    %39 = vector.load %arg2[%c4, %c0_27, %c0_28] : memref<7x32x32xf32, #tpu.memory_space<vmem>>, vector<1x32x32xf32>
    %40 = vector.shape_cast %39 : vector<1x32x32xf32> to vector<32x32xf32>
    %cst_29 = arith.constant dense<0.000000e+00> : vector<128x32xf32>
    %41 = tpu.matmul %38, %40, %cst_29 {dimension_numbers = #tpu.dot_dimension_numbers<[1], [0], [0], [1], [0, 0, 1, 1], [], []>} : vector<128x32xf32>, vector<32x32xf32>, vector<128x32xf32> -> vector<128x32xf32>
    %cst_30 = arith.constant dense<0.000000e+00> : vector<128x32xf32>
    %42 = tpu.matmul %0, %41, %cst_30 {dimension_numbers = #tpu.dot_dimension_numbers<[1], [0], [0], [1], [0, 0, 1, 1], [], []>} : vector<128x128xf32>, vector<128x32xf32>, vector<128x32xf32> -> vector<128x32xf32>
    %c244 = arith.constant 244 : index
    %c0_31 = arith.constant 0 : index
    %43 = vector.load %arg4[%c244, %c0_31] : memref<250x128xf32, #tpu.memory_space<vmem>>, vector<1x32xf32>
    %44 = vector.broadcast %43 : vector<1x32xf32> to vector<128x32xf32>
    %45 = arith.addf %42, %44 : vector<128x32xf32>
    %46 = arith.addf %45, %29 : vector<128x32xf32>
    %cst_32 = arith.constant 0.000000e+00 : f32
    %47 = vector.broadcast %cst_32 : f32 to vector<128x32xf32>
    %48 = arith.maximumf %46, %47 : vector<128x32xf32>
    %c5 = arith.constant 5 : index
    %c0_33 = arith.constant 0 : index
    %c0_34 = arith.constant 0 : index
    %49 = vector.load %arg2[%c5, %c0_33, %c0_34] : memref<7x32x32xf32, #tpu.memory_space<vmem>>, vector<1x32x32xf32>
    %50 = vector.shape_cast %49 : vector<1x32x32xf32> to vector<32x32xf32>
    %cst_35 = arith.constant dense<0.000000e+00> : vector<128x32xf32>
    %51 = tpu.matmul %48, %50, %cst_35 {dimension_numbers = #tpu.dot_dimension_numbers<[1], [0], [0], [1], [0, 0, 1, 1], [], []>} : vector<128x32xf32>, vector<32x32xf32>, vector<128x32xf32> -> vector<128x32xf32>
    %cst_36 = arith.constant dense<0.000000e+00> : vector<128x32xf32>
    %52 = tpu.matmul %0, %51, %cst_36 {dimension_numbers = #tpu.dot_dimension_numbers<[1], [0], [0], [1], [0, 0, 1, 1], [], []>} : vector<128x128xf32>, vector<128x32xf32>, vector<128x32xf32> -> vector<128x32xf32>
    %c245 = arith.constant 245 : index
    %c0_37 = arith.constant 0 : index
    %53 = vector.load %arg4[%c245, %c0_37] : memref<250x128xf32, #tpu.memory_space<vmem>>, vector<1x32xf32>
    %54 = vector.broadcast %53 : vector<1x32xf32> to vector<128x32xf32>
    %55 = arith.addf %52, %54 : vector<128x32xf32>
    %cst_38 = arith.constant 0.000000e+00 : f32
    %56 = vector.broadcast %cst_38 : f32 to vector<128x32xf32>
    %57 = arith.maximumf %55, %56 : vector<128x32xf32>
    %c6 = arith.constant 6 : index
    %c0_39 = arith.constant 0 : index
    %c0_40 = arith.constant 0 : index
    %58 = vector.load %arg2[%c6, %c0_39, %c0_40] : memref<7x32x32xf32, #tpu.memory_space<vmem>>, vector<1x32x32xf32>
    %59 = vector.shape_cast %58 : vector<1x32x32xf32> to vector<32x32xf32>
    %cst_41 = arith.constant dense<0.000000e+00> : vector<128x32xf32>
    %60 = tpu.matmul %57, %59, %cst_41 {dimension_numbers = #tpu.dot_dimension_numbers<[1], [0], [0], [1], [0, 0, 1, 1], [], []>} : vector<128x32xf32>, vector<32x32xf32>, vector<128x32xf32> -> vector<128x32xf32>
    %cst_42 = arith.constant dense<0.000000e+00> : vector<128x32xf32>
    %61 = tpu.matmul %0, %60, %cst_42 {dimension_numbers = #tpu.dot_dimension_numbers<[1], [0], [0], [1], [0, 0, 1, 1], [], []>} : vector<128x128xf32>, vector<128x32xf32>, vector<128x32xf32> -> vector<128x32xf32>
    %c246 = arith.constant 246 : index
    %c0_43 = arith.constant 0 : index
    %62 = vector.load %arg4[%c246, %c0_43] : memref<250x128xf32, #tpu.memory_space<vmem>>, vector<1x32xf32>
    %63 = vector.broadcast %62 : vector<1x32xf32> to vector<128x32xf32>
    %64 = arith.addf %61, %63 : vector<128x32xf32>
    %65 = arith.addf %64, %48 : vector<128x32xf32>
    %cst_44 = arith.constant 0.000000e+00 : f32
    %66 = vector.broadcast %cst_44 : f32 to vector<128x32xf32>
    %67 = arith.maximumf %65, %66 : vector<128x32xf32>
    %c0_45 = arith.constant 0 : index
    %c0_46 = arith.constant 0 : index
    %68 = vector.load %arg3[%c0_45, %c0_46] : memref<160x512xf32, #tpu.memory_space<vmem>>, vector<32x512xf32>
    %c32 = arith.constant 32 : index
    %c0_47 = arith.constant 0 : index
    %69 = vector.load %arg3[%c32, %c0_47] : memref<160x512xf32, #tpu.memory_space<vmem>>, vector<128x512xf32>
    %cst_48 = arith.constant dense<0.000000e+00> : vector<128x512xf32>
    %70 = tpu.matmul %67, %68, %cst_48 {dimension_numbers = #tpu.dot_dimension_numbers<[1], [0], [0], [1], [0, 0, 1, 1], [], []>} : vector<128x32xf32>, vector<32x512xf32>, vector<128x512xf32> -> vector<128x512xf32>
    %71 = arith.mulf %70, %69 : vector<128x512xf32>
    %72 = vector.extract_strided_slice %71 {offsets = [0, 0], sizes = [128, 64], strides = [1, 1]} : vector<128x512xf32> to vector<128x64xf32>
    %73 = vector.extract_strided_slice %71 {offsets = [0, 64], sizes = [128, 64], strides = [1, 1]} : vector<128x512xf32> to vector<128x64xf32>
    %74 = arith.addf %72, %73 : vector<128x64xf32>
    %75 = vector.extract_strided_slice %71 {offsets = [0, 128], sizes = [128, 64], strides = [1, 1]} : vector<128x512xf32> to vector<128x64xf32>
    %76 = arith.addf %74, %75 : vector<128x64xf32>
    %77 = vector.extract_strided_slice %71 {offsets = [0, 192], sizes = [128, 64], strides = [1, 1]} : vector<128x512xf32> to vector<128x64xf32>
    %78 = arith.addf %76, %77 : vector<128x64xf32>
    %79 = vector.extract_strided_slice %71 {offsets = [0, 256], sizes = [128, 64], strides = [1, 1]} : vector<128x512xf32> to vector<128x64xf32>
    %80 = arith.addf %78, %79 : vector<128x64xf32>
    %81 = vector.extract_strided_slice %71 {offsets = [0, 320], sizes = [128, 64], strides = [1, 1]} : vector<128x512xf32> to vector<128x64xf32>
    %82 = arith.addf %80, %81 : vector<128x64xf32>
    %83 = vector.extract_strided_slice %71 {offsets = [0, 384], sizes = [128, 64], strides = [1, 1]} : vector<128x512xf32> to vector<128x64xf32>
    %84 = arith.addf %82, %83 : vector<128x64xf32>
    %85 = vector.extract_strided_slice %71 {offsets = [0, 448], sizes = [128, 64], strides = [1, 1]} : vector<128x512xf32> to vector<128x64xf32>
    %86 = arith.addf %84, %85 : vector<128x64xf32>
    %c128 = arith.constant 128 : index
    %c0_49 = arith.constant 0 : index
    %87 = vector.load %arg4[%c128, %c0_49] : memref<250x128xf32, #tpu.memory_space<vmem>>, vector<16x128xf32>
    %cst_50 = arith.constant dense<0.000000e+00> : vector<16x64xf32>
    %88 = tpu.matmul %87, %86, %cst_50 {dimension_numbers = #tpu.dot_dimension_numbers<[1], [0], [0], [1], [0, 0, 1, 1], [], []>} : vector<16x128xf32>, vector<128x64xf32>, vector<16x64xf32> -> vector<16x64xf32>
    %c247 = arith.constant 247 : index
    %c0_51 = arith.constant 0 : index
    %89 = vector.load %arg4[%c247, %c0_51] : memref<250x128xf32, #tpu.memory_space<vmem>>, vector<1x64xf32>
    %90 = vector.broadcast %89 : vector<1x64xf32> to vector<16x64xf32>
    %91 = arith.addf %88, %90 : vector<16x64xf32>
    %cst_52 = arith.constant 0.000000e+00 : f32
    %92 = vector.broadcast %cst_52 : f32 to vector<16x64xf32>
    %93 = arith.maximumf %91, %92 : vector<16x64xf32>
    %c144 = arith.constant 144 : index
    %c0_53 = arith.constant 0 : index
    %94 = vector.load %arg4[%c144, %c0_53] : memref<250x128xf32, #tpu.memory_space<vmem>>, vector<64x32xf32>
    %cst_54 = arith.constant dense<0.000000e+00> : vector<16x32xf32>
    %95 = tpu.matmul %93, %94, %cst_54 {dimension_numbers = #tpu.dot_dimension_numbers<[1], [0], [0], [1], [0, 0, 1, 1], [], []>} : vector<16x64xf32>, vector<64x32xf32>, vector<16x32xf32> -> vector<16x32xf32>
    %c248 = arith.constant 248 : index
    %c0_55 = arith.constant 0 : index
    %96 = vector.load %arg4[%c248, %c0_55] : memref<250x128xf32, #tpu.memory_space<vmem>>, vector<1x32xf32>
    %97 = vector.broadcast %96 : vector<1x32xf32> to vector<16x32xf32>
    %98 = arith.addf %95, %97 : vector<16x32xf32>
    %cst_56 = arith.constant 0.000000e+00 : f32
    %99 = vector.broadcast %cst_56 : f32 to vector<16x32xf32>
    %100 = arith.maximumf %98, %99 : vector<16x32xf32>
    %c208 = arith.constant 208 : index
    %c0_57 = arith.constant 0 : index
    %101 = vector.load %arg4[%c208, %c0_57] : memref<250x128xf32, #tpu.memory_space<vmem>>, vector<32x128xf32>
    %cst_58 = arith.constant dense<0.000000e+00> : vector<16x128xf32>
    %102 = tpu.matmul %100, %101, %cst_58 {dimension_numbers = #tpu.dot_dimension_numbers<[1], [0], [0], [1], [0, 0, 1, 1], [], []>} : vector<16x32xf32>, vector<32x128xf32>, vector<16x128xf32> -> vector<16x128xf32>
    %c249 = arith.constant 249 : index
    %c0_59 = arith.constant 0 : index
    %103 = vector.load %arg4[%c249, %c0_59] : memref<250x128xf32, #tpu.memory_space<vmem>>, vector<1x128xf32>
    %104 = vector.broadcast %103 : vector<1x128xf32> to vector<16x128xf32>
    %105 = arith.addf %102, %104 : vector<16x128xf32>
    %cst_60 = arith.constant dense<0xFF800000> : vector<16xf32>
    %106 = vector.multi_reduction <maximumf>, %105, %cst_60 [1] : vector<16x128xf32> to vector<16xf32>
    %107 = vector.shape_cast %106 : vector<16xf32> to vector<16x1xf32>
    %108 = vector.broadcast %107 : vector<16x1xf32> to vector<16x128xf32>
    %109 = arith.subf %105, %108 : vector<16x128xf32>
    %110 = math.exp %109 : vector<16x128xf32>
    %cst_61 = arith.constant dense<0.000000e+00> : vector<16xf32>
    %111 = vector.multi_reduction <add>, %110, %cst_61 [1] : vector<16x128xf32> to vector<16xf32>
    %112 = vector.shape_cast %111 : vector<16xf32> to vector<16x1xf32>
    %113 = vector.broadcast %112 : vector<16x1xf32> to vector<16x128xf32>
    %114 = arith.divf %110, %113 : vector<16x128xf32>
    %c0_62 = arith.constant 0 : index
    %c0_63 = arith.constant 0 : index
    %115 = vector.load %arg5[%c0_62, %c0_63] : memref<16x128xf32, #tpu.memory_space<vmem>>, vector<16x128xf32>
    tpu.vector_store %arg5[%c0_62, %c0_63], %114 {strides = array<i32>} : memref<16x128xf32, #tpu.memory_space<vmem>>, vector<16x128xf32>,
    return
  }
  func.func @transform_0(%arg0: i32) -> (i32, i32) {
    %c0_i32 = arith.constant 0 : i32
    %c0_i32_0 = arith.constant 0 : i32
    return %arg0, %c0_i32 : i32, i32
  }
  func.func @transform_1(%arg0: i32) -> (i32, i32, i32) {
    %c0_i32 = arith.constant 0 : i32
    %c0_i32_0 = arith.constant 0 : i32
    %c0_i32_1 = arith.constant 0 : i32
    %c0_i32_2 = arith.constant 0 : i32
    return %c0_i32, %c0_i32_0, %c0_i32_1 : i32, i32, i32
  }
  func.func @transform_2(%arg0: i32) -> (i32, i32) {
    %c0_i32 = arith.constant 0 : i32
    %c0_i32_0 = arith.constant 0 : i32
    %c0_i32_1 = arith.constant 0 : i32
    return %c0_i32, %c0_i32_0 : i32, i32
  }
  func.func @transform_3(%arg0: i32) -> (i32, i32) {
    %c0_i32 = arith.constant 0 : i32
    %c0_i32_0 = arith.constant 0 : i32
    %c0_i32_1 = arith.constant 0 : i32
    return %c0_i32, %c0_i32_0 : i32, i32
  }
  func.func @transform_4(%arg0: i32) -> (i32, i32) {
    %c0_i32 = arith.constant 0 : i32
    %c0_i32_0 = arith.constant 0 : i32
    return %arg0, %c0_i32 : i32, i32
  }
}

</mosaic_0001>

<bundles_post_ra>
// kernel: tpu_custom_call.1
= control target key start
LH: loop header
LB: loop body
LE: loop exit
PB: predicated region body
PF: predicated region fallthrough
CT: control target
= control target key end

     0   :  { %9 = vsyncpa [#allocation3], 0  ;;  %s4103_s0 = inlined_call_operand.vmem [shape: f32[128,32], index: 0, kind: input, shape index: {}]   ;;  %s4104_s1 = inlined_call_operand.hbm [shape: f32[7,32,32], index: 1, kind: input, shape index: {}]   ;;  %s4105_s2 = inlined_call_operand.hbm [shape: f32[160,512], index: 2, kind: input, shape index: {}]   ;;  %s4106_s3 = inlined_call_operand.hbm [shape: f32[250,128], index: 3, kind: input, shape index: {}]   ;;  %s4107_s4 = inlined_call_operand.hbm [shape: f32[16,128], index: 4, kind: output, shape index: {}]  }
   0x1   :  { %10 = vsyncpa [#allocation6], 0  ;;  %s31_s17 = sshll.u32 %s4105_s2, 4  ;;  %s32_s17 = int_to_ptr.hbm [resolvable:$true] %s31_s17 }
   0x2   :  { %11 = vsyncpa [#allocation4], 0  ;;  %s2877_s18 = smov [#allocation5]   ;;  %s18_s22 = sshll.u32 %s4104_s1, 4  ;;  %s19_s22 = int_to_ptr.hbm [resolvable:$true] %s18_s22 }
   0x3   :  { %s33_s19 = sshll.u32 %s2877_s18, 4  ;;  %s2878_s23 = smov 512   ;;  %s34_s19 = int_to_ptr.vmem [resolvable:$true] %s33_s19 }
   0x4   :  { %s2879_s24 = smov 32   ;;  %s2880_s25 = smov [#allocation2]  }
   0x5   :  { %39 = dma.hbm_to_vmem [thread:$0]  %s32_s17, 10240, %s34_s19, [#allocation6], %s2878_s23, %s2878_s23, %s2879_s24  }
   0x6   :  { %s20_s26 = sshll.u32 %s2880_s25, 4  ;;  %s2881_s27 = smov 128   ;;  %s21_s26 = int_to_ptr.vmem [resolvable:$true] %s20_s26 }
   0x7   :  { %s2882_s28 = smov 8   ;;  %s44_s30 = sshll.u32 %s4106_s3, 4  ;;  %s45_s30 = int_to_ptr.hbm [resolvable:$true] %s44_s30 }
   0x8   :  { %26 = dma.hbm_to_vmem [thread:$0]  %s19_s22, 3584, %s21_s26, [#allocation3], %s2881_s27, %s2881_s27, %s2882_s28  }
   0x9   :  { %s2883_s5 = smov [#allocation7]  }
   0xa   :  { %s46_s1 = sshll.u32 %s2883_s5, 4  ;;  %s47_s1 = int_to_ptr.vmem [resolvable:$true] %s46_s1 }
   0xb   :  { %52 = dma.hbm_to_vmem [thread:$0]  %s45_s30, 4096, %s47_s1, [#allocation6], %s2881_s27, %s2881_s27, %s2882_s28  }
   0xc   :  { %2871 = dma.done.wait [#allocation3], 3584  }
   0xd   :  { %2872 = vsyncadd [#allocation3], 4294963712 }
   0xe   :  { %2873 = dma.done.wait [#allocation6], 14336  }
   0xf   :  { %2874 = vsyncadd [#allocation6], 4294952960  ;;  %v100_v0 = vld [vmem:[#allocation2 + $0x18] sm:$0xff]  ;;  %v99_v1 = vld [vmem:[#allocation2 + $0x10] sm:$0xff]  ;;  %vm101_vm0 = vcmask 261120   ;;  %vm2411_vm1 = vcmask 523264  }
  0x10   :  { %162 = vmatpush.msra.mxu0 %v100_v0  ;;  %2724 = vmatpush.msra.mxu3 %v100_v0  ;;  %v98_v2 = vld [vmem:[#allocation2 + $0x8] sm:$0xff]  ;;  %v97_v3 = vld [vmem:[#allocation2] sm:$0xff]  ;;  %v92_v5 = vld [vmem:[%s4103_s0 + $0x58] sm:$0xff]  ;;  %s2885_s10 = smov [#allocation8]   ;;  %s2530_s14 = sshll.u32 %s4107_s4, 4  ;;  %s2531_s14 = int_to_ptr.hbm [resolvable:$true] %s2530_s14 }
  0x11   :  { %v81_v4 = vld [vmem:[%s4103_s0] sm:$0xff]  ;;  %v82_v6 = vld [vmem:[%s4103_s0 + $0x8] sm:$0xff]  ;;  %v83_v8 = vld [vmem:[%s4103_s0 + $0x10] sm:$0xff]  ;;  %s2528_s11 = sshll.u32 %s2885_s10, 4  ;;  %s2529_s11 = int_to_ptr.vmem [resolvable:$true] %s2528_s11 }
  0x12   :  { %163 = vmatpush.msra.mxu0 %v99_v1  ;;  %2725 = vmatpush.msra.mxu3 %v99_v1  ;;  %v93_v7 = vld [vmem:[%s4103_s0 + $0x60] sm:$0xff]  ;;  %v94_v9 = vld [vmem:[%s4103_s0 + $0x68] sm:$0xff]  ;;  %v84_v10 = vld [vmem:[%s4103_s0 + $0x18] sm:$0xff] }
  0x13   :  { %v95_v11 = vld [vmem:[%s4103_s0 + $0x70] sm:$0xff]  ;;  %v85_v12 = vld [vmem:[%s4103_s0 + $0x20] sm:$0xff]  ;;  %v96_v13 = vld [vmem:[%s4103_s0 + $0x78] sm:$0xff] }
  0x14   :  { %164 = vmatpush.msra.mxu0 %v98_v2  ;;  %2726 = vmatpush.msra.mxu3 %v98_v2  ;;  %v86_v14 = vld [vmem:[%s4103_s0 + $0x28] sm:$0xff]  ;;  %v87_v15 = vld [vmem:[%s4103_s0 + $0x30] sm:$0xff]  ;;  %v88_v16 = vld [vmem:[%s4103_s0 + $0x38] sm:$0xff] }
  0x15   :  { %v89_v17 = vld [vmem:[%s4103_s0 + $0x40] sm:$0xff]  ;;  %v90_v18 = vld [vmem:[%s4103_s0 + $0x48] sm:$0xff]  ;;  %v91_v19 = vld [vmem:[%s4103_s0 + $0x50] sm:$0xff]  ;;  %s2884_s0 = smov 64  }
  0x16   :  { %165 = vmatpush.msra.mxu0 %v97_v3  ;;  %2727 = vmatpush.msra.mxu3 %v97_v3  ;;  %v2990_v36 = vld [vmem:[#allocation7] sm:$0xff]  ;;  %v2993_v37 = vld [vmem:[#allocation7 + $0x8] sm:$0xff]  ;;  %v2996_v38 = vld [vmem:[#allocation7 + $0x10] sm:$0xff] }
  0x17   :  { %2544 = vmatmul.msk.f32.vlgmr.msra.gmra.mxu0 %vm101_vm0, %v81_v4  ;;  %2555 = vmatmul.msk.f32.vlgmr.msra.gmra.mxu3 %vm101_vm0, %v92_v5  ;;  %v2999_v39 = vld [vmem:[#allocation7 + $0x18] sm:$0xff]  ;;  %v3002_v40 = vld [vmem:[#allocation7 + $0x20] sm:$0xff]  ;;  %v3005_v41 = vld [vmem:[#allocation7 + $0x28] sm:$0xff] }
  0x18   :  { %v3008_v42 = vld [vmem:[#allocation7 + $0x30] sm:$0xff]  ;;  %v3011_v43 = vld [vmem:[#allocation7 + $0x38] sm:$0xff]  ;;  %v3014_v44 = vld [vmem:[#allocation7 + $0x40] sm:$0xff] }
  0x19   :  { %v3017_v45 = vld [vmem:[#allocation7 + $0x48] sm:$0xff]  ;;  %v3020_v46 = vld [vmem:[#allocation7 + $0x50] sm:$0xff]  ;;  %v3023_v47 = vld [vmem:[#allocation7 + $0x58] sm:$0xff] }
  0x1a   :  { %v302_v48 = vld [vmem:[#allocation2 + $0x38] sm:$0xff]  ;;  %v301_v49 = vld [vmem:[#allocation2 + $0x30] sm:$0xff]  ;;  %v3026_v50 = vld [vmem:[#allocation7 + $0x60] sm:$0xff] }
  0x1b   :  { %2728 = vmatpush.msra.mxu2 %v302_v48  ;;  %v300_v51 = vld [vmem:[#allocation2 + $0x28] sm:$0xff]  ;;  %v299_v52 = vld [vmem:[#allocation2 + $0x20] sm:$0xff]  ;;  %v3032_v54 = vld [vmem:[#allocation7 + $0x70] sm:$0xff] }
  0x1c   :  { %v3029_v53 = vld [vmem:[#allocation7 + $0x68] sm:$0xff]  ;;  %v3035_v55 = vld [vmem:[#allocation7 + $0x78] sm:$0xff]  ;;  %v2741_v56 = vld [vmem:[#allocation7 + $0xf0] ss:$0 sm:$0xff] }
  0x1d   :  { %2729 = vmatpush.msra.mxu2 %v301_v49 }
  0x1f   :  { %2545 = vmatmul.msk.f32.gmra.mxu0 %vm101_vm0, %v82_v6  ;;  %2556 = vmatmul.msk.f32.gmra.mxu3 %vm101_vm0, %v93_v7 }
  0x20   :  { %2730 = vmatpush.msra.mxu2 %v300_v51 }
  0x22   :  { %2731 = vmatpush.msra.mxu2 %v299_v52 }
  0x27   :  { %2546 = vmatmul.msk.f32.gmra.mxu0 %vm101_vm0, %v83_v8  ;;  %2557 = vmatmul.msk.f32.gmra.mxu3 %vm101_vm0, %v94_v9 }
  0x2f   :  { %2547 = vmatmul.msk.f32.gmra.mxu0 %vm101_vm0, %v84_v10  ;;  %2558 = vmatmul.msk.f32.gmra.mxu3 %vm101_vm0, %v95_v11 }
  0x37   :  { %2548 = vmatmul.msk.f32.gmra.mxu0 %vm101_vm0, %v85_v12  ;;  %2559 = vmatmul.msk.f32.gmra.mxu3 %vm101_vm0, %v96_v13 }
  0x3f   :  { %2549 = vmatmul.msk.f32.gmra.mxu0 %vm101_vm0, %v86_v14 }
  0x47   :  { %2550 = vmatmul.msk.f32.gmra.mxu0 %vm101_vm0, %v87_v15 }
  0x4f   :  { %2551 = vmatmul.msk.f32.gmra.mxu0 %vm101_vm0, %v88_v16 }
  0x57   :  { %2552 = vmatmul.msk.f32.gmra.mxu0 %vm101_vm0, %v89_v17 }
  0x5f   :  { %2553 = vmatmul.msk.f32.gmra.mxu0 %vm101_vm0, %v90_v18 }
  0x67   :  { %2554 = vmatmul.msk.f32.gmra.mxu0 %vm101_vm0, %v91_v19 }
  0x94   :  { %v167_v20 = vpop.f32.mrf.mxu0 }
  0x9a   :  { %v200_v21 = vpop.f32.mrf.mxu3 }
  0x9c   :  { %v170_v22 = vpop.f32.mrf.mxu0 }
  0xa2   :  { %v203_v23 = vpop.f32.mrf.mxu3 }
  0xa4   :  { %v173_v24 = vpop.f32.mrf.mxu0 }
  0xaa   :  { %v206_v25 = vpop.f32.mrf.mxu3 }
  0xac   :  { %v176_v26 = vpop.f32.mrf.mxu0 }
  0xb2   :  { %v209_v27 = vpop.f32.mrf.mxu3 }
  0xb4   :  { %v179_v28 = vpop.f32.mrf.mxu0 }
  0xba   :  { %v212_v29 = vpop.f32.mrf.mxu3 }
  0xbb   :  { %217 = vmatpush.msra.mxu1 %v212_v29 }
  0xbc   :  { %v182_v30 = vpop.f32.mrf.mxu0 }
  0xbd   :  { %218 = vmatpush.msra.mxu1 %v209_v27 }
  0xbf   :  { %219 = vmatpush.msra.mxu1 %v206_v25 }
  0xc1   :  { %220 = vmatpush.msra.mxu1 %v203_v23 }
  0xc3   :  { %221 = vmatpush.msra.mxu1 %v200_v21 }
  0xc4   :  { %v185_v31 = vpop.f32.mrf.mxu0 }
  0xcc   :  { %v188_v32 = vpop.f32.mrf.mxu0 }
  0xd4   :  { %v191_v33 = vpop.f32.mrf.mxu0 }
  0xdc   :  { %v194_v34 = vpop.f32.mrf.mxu0 }
  0xe4   :  { %v197_v35 = vpop.f32.mrf.mxu0 }
  0xe5   :  { %222 = vmatpush.msra.mxu1 %v197_v35 }
  0xe7   :  { %223 = vmatpush.msra.mxu1 %v194_v34 }
  0xe9   :  { %224 = vmatpush.msra.mxu1 %v191_v33 }
  0xeb   :  { %225 = vmatpush.msra.mxu1 %v188_v32 }
  0xed   :  { %226 = vmatpush.msra.mxu1 %v185_v31 }
  0xef   :  { %227 = vmatpush.msra.mxu1 %v182_v30 }
  0xf1   :  { %228 = vmatpush.msra.mxu1 %v179_v28 }
  0xf3   :  { %229 = vmatpush.msra.mxu1 %v176_v26 }
  0xf5   :  { %230 = vmatpush.msra.mxu1 %v173_v24 }
  0xf7   :  { %231 = vmatpush.msra.mxu1 %v170_v22 }
  0xf9   :  { %232 = vmatpush.msra.mxu1 %v167_v20 }
  0xfa   :  { %233 = vmatmul.f32.vlgmr.msra.gmra.mxu1 %v2990_v36 }
  0xfb   :  { %363 = vmatpush.msrb.mxu1 %v302_v48 }
  0xfd   :  { %364 = vmatpush.msrb.mxu1 %v301_v49 }
  0xff   :  { %365 = vmatpush.msrb.mxu1 %v300_v51 }
 0x101   :  { %366 = vmatpush.msrb.mxu1 %v299_v52 }
 0x102   :  { %236 = vmatmul.f32.gmra.mxu1 %v2993_v37 }
 0x10a   :  { %239 = vmatmul.f32.gmra.mxu1 %v2996_v38 }
 0x112   :  { %242 = vmatmul.f32.gmra.mxu1 %v2999_v39 }
 0x11a   :  { %245 = vmatmul.f32.gmra.mxu1 %v3002_v40 }
 0x122   :  { %248 = vmatmul.f32.gmra.mxu1 %v3005_v41 }
 0x12a   :  { %251 = vmatmul.f32.gmra.mxu1 %v3008_v42 }
 0x132   :  { %254 = vmatmul.f32.gmra.mxu1 %v3011_v43 }
 0x13a   :  { %257 = vmatmul.f32.gmra.mxu1 %v3014_v44 }
 0x142   :  { %260 = vmatmul.f32.gmra.mxu1 %v3017_v45 }
 0x14a   :  { %263 = vmatmul.f32.gmra.mxu1 %v3020_v46 }
 0x152   :  { %266 = vmatmul.f32.gmra.mxu1 %v3023_v47 }
 0x15a   :  { %269 = vmatmul.f32.gmra.mxu1 %v3026_v50 }
 0x162   :  { %272 = vmatmul.f32.gmra.mxu1 %v3029_v53 }
 0x16a   :  { %275 = vmatmul.f32.gmra.mxu1 %v3032_v54 }
 0x172   :  { %278 = vmatmul.f32.gmra.mxu1 %v3035_v55 }
 0x177   :  { %v234_v57 = vpop.f32.mrf.mxu1 }
 0x178   :  { %v3038_v58 = vadd.f32 %v2741_v56, %v234_v57 }
 0x17a   :  { %v282_v59 = vmax.f32 %v3038_v58, 0.0 }
 0x17c   :  { %2560 = vmatmul.msk.f32.vlgmr.msrb.gmra.mxu1 %vm101_vm0, %v282_v59 }
 0x17f   :  { %v237_v60 = vpop.f32.mrf.mxu1 }
 0x180   :  { %v3044_v61 = vadd.f32 %v2741_v56, %v237_v60 }
 0x182   :  { %v283_v62 = vmax.f32 %v3044_v61, 0.0 }
 0x184   :  { %2561 = vmatmul.msk.f32.gmra.mxu1 %vm101_vm0, %v283_v62 }
 0x187   :  { %v240_v63 = vpop.f32.mrf.mxu1 }
 0x188   :  { %v3050_v0 = vadd.f32 %v2741_v56, %v240_v63 }
 0x18a   :  { %v284_v1 = vmax.f32 %v3050_v0, 0.0 }
 0x18c   :  { %2562 = vmatmul.msk.f32.gmra.mxu1 %vm101_vm0, %v284_v1 }
 0x18f   :  { %v243_v2 = vpop.f32.mrf.mxu1 }
 0x190   :  { %v3056_v3 = vadd.f32 %v2741_v56, %v243_v2 }
 0x192   :  { %v285_v4 = vmax.f32 %v3056_v3, 0.0 }
 0x194   :  { %2563 = vmatmul.msk.f32.gmra.mxu1 %vm101_vm0, %v285_v4 }
 0x197   :  { %v246_v5 = vpop.f32.mrf.mxu1 }
 0x198   :  { %v3062_v6 = vadd.f32 %v2741_v56, %v246_v5 }
 0x19a   :  { %v286_v7 = vmax.f32 %v3062_v6, 0.0 }
 0x19c   :  { %2564 = vmatmul.msk.f32.gmra.mxu1 %vm101_vm0, %v286_v7 }
 0x19f   :  { %v249_v8 = vpop.f32.mrf.mxu1 }
 0x1a0   :  { %v3068_v9 = vadd.f32 %v2741_v56, %v249_v8 }
 0x1a2   :  { %v287_v10 = vmax.f32 %v3068_v9, 0.0 }
 0x1a4   :  { %2565 = vmatmul.msk.f32.vlgmr.msra.gmra.mxu2 %vm101_vm0, %v287_v10 }
 0x1a7   :  { %v252_v11 = vpop.f32.mrf.mxu1 }
 0x1a8   :  { %v3074_v12 = vadd.f32 %v2741_v56, %v252_v11 }
 0x1aa   :  { %v288_v13 = vmax.f32 %v3074_v12, 0.0 }
 0x1ac   :  { %2566 = vmatmul.msk.f32.gmra.mxu2 %vm101_vm0, %v288_v13 }
 0x1af   :  { %v255_v14 = vpop.f32.mrf.mxu1 }
 0x1b0   :  { %v3080_v15 = vadd.f32 %v2741_v56, %v255_v14 }
 0x1b2   :  { %v289_v16 = vmax.f32 %v3080_v15, 0.0 }
 0x1b4   :  { %2567 = vmatmul.msk.f32.gmra.mxu2 %vm101_vm0, %v289_v16 }
 0x1b7   :  { %v258_v17 = vpop.f32.mrf.mxu1 }
 0x1b8   :  { %v3086_v18 = vadd.f32 %v2741_v56, %v258_v17 }
 0x1ba   :  { %v290_v19 = vmax.f32 %v3086_v18, 0.0 }
 0x1bc   :  { %2568 = vmatmul.msk.f32.gmra.mxu2 %vm101_vm0, %v290_v19 }
 0x1bf   :  { %v261_v20 = vpop.f32.mrf.mxu1 }
 0x1c0   :  { %v3092_v21 = vadd.f32 %v2741_v56, %v261_v20 }
 0x1c2   :  { %v291_v22 = vmax.f32 %v3092_v21, 0.0 }
 0x1c4   :  { %2569 = vmatmul.msk.f32.gmra.mxu2 %vm101_vm0, %v291_v22 }
 0x1c7   :  { %v264_v23 = vpop.f32.mrf.mxu1 }
 0x1c8   :  { %v3098_v24 = vadd.f32 %v2741_v56, %v264_v23 }
 0x1ca   :  { %v292_v25 = vmax.f32 %v3098_v24, 0.0 }
 0x1cc   :  { %2570 = vmatmul.msk.f32.gmra.mxu2 %vm101_vm0, %v292_v25 }
 0x1cf   :  { %v267_v26 = vpop.f32.mrf.mxu1 }
 0x1d0   :  { %v3104_v27 = vadd.f32 %v2741_v56, %v267_v26 }
 0x1d2   :  { %v293_v28 = vmax.f32 %v3104_v27, 0.0 }
 0x1d4   :  { %2571 = vmatmul.msk.f32.gmra.mxu2 %vm101_vm0, %v293_v28 }
 0x1d7   :  { %v270_v29 = vpop.f32.mrf.mxu1 }
 0x1d8   :  { %v3110_v30 = vadd.f32 %v2741_v56, %v270_v29 }
 0x1da   :  { %v4111_v31 = vmax.f32 %v3110_v30, 0.0 }
 0x1dc   :  { %2572 = vmatmul.msk.f32.gmra.mxu2 %vm101_vm0, %v4111_v31 }
 0x1df   :  { %v273_v32 = vpop.f32.mrf.mxu1 }
 0x1e0   :  { %v3116_v33 = vadd.f32 %v2741_v56, %v273_v32 }
 0x1e2   :  { %v4110_v34 = vmax.f32 %v3116_v33, 0.0 }
 0x1e4   :  { %2573 = vmatmul.msk.f32.gmra.mxu2 %vm101_vm0, %v4110_v34 }
 0x1e7   :  { %v276_v35 = vpop.f32.mrf.mxu1 }
 0x1e8   :  { %v3122_v48 = vadd.f32 %v2741_v56, %v276_v35 }
 0x1ea   :  { %v4109_v49 = vmax.f32 %v3122_v48, 0.0 }
 0x1ec   :  { %2574 = vmatmul.msk.f32.gmra.mxu2 %vm101_vm0, %v4109_v49 }
 0x1ef   :  { %v279_v51 = vpop.f32.mrf.mxu1 }
 0x1f0   :  { %v3128_v52 = vadd.f32 %v2741_v56, %v279_v51 }
 0x1f2   :  { %v4108_v57 = vmax.f32 %v3128_v52, 0.0 }
 0x1f4   :  { %2575 = vmatmul.msk.f32.gmra.mxu2 %vm101_vm0, %v4108_v57 }
 0x1f9   :  { %v368_v20 = vpop.f32.mrf.mxu1 }
 0x201   :  { %v371_v26 = vpop.f32.mrf.mxu1 }
 0x209   :  { %v374_v32 = vpop.f32.mrf.mxu1 }
 0x211   :  { %v377_v35 = vpop.f32.mrf.mxu1 }
 0x219   :  { %v380_v51 = vpop.f32.mrf.mxu1 }
 0x227   :  { %v383_v60 = vpop.f32.mrf.mxu2 }
 0x22f   :  { %v386_v63 = vpop.f32.mrf.mxu2 }
 0x237   :  { %v389_v2 = vpop.f32.mrf.mxu2 }
 0x23f   :  { %v392_v5 = vpop.f32.mrf.mxu2 }
 0x247   :  { %v395_v8 = vpop.f32.mrf.mxu2 }
 0x24f   :  { %v398_v11 = vpop.f32.mrf.mxu2 }
 0x257   :  { %v401_v14 = vpop.f32.mrf.mxu2 }
 0x25f   :  { %v404_v17 = vpop.f32.mrf.mxu2 }
 0x267   :  { %v407_v23 = vpop.f32.mrf.mxu2 }
 0x26f   :  { %v410_v29 = vpop.f32.mrf.mxu2 }
 0x277   :  { %v413_v56 = vpop.f32.mrf.mxu2 }
 0x278   :  { %418 = vmatpush.msrb.mxu3 %v413_v56 }
 0x27a   :  { %419 = vmatpush.msrb.mxu3 %v410_v29 }
 0x27c   :  { %420 = vmatpush.msrb.mxu3 %v407_v23 }
 0x27e   :  { %421 = vmatpush.msrb.mxu3 %v404_v17 }
 0x280   :  { %422 = vmatpush.msrb.mxu3 %v401_v14 }
 0x282   :  { %423 = vmatpush.msrb.mxu3 %v398_v11 }
 0x284   :  { %424 = vmatpush.msrb.mxu3 %v395_v8  ;;  %v2742_v8 = vld [vmem:[#allocation7 + $0xf1] ss:$0 sm:$0xff] }
 0x286   :  { %425 = vmatpush.msrb.mxu3 %v392_v5  ;;  %v500_v5 = vld [vmem:[#allocation2 + $0x40] sm:$0xff] }
 0x288   :  { %426 = vmatpush.msrb.mxu3 %v389_v2  ;;  %v501_v2 = vld [vmem:[#allocation2 + $0x48] sm:$0xff] }
 0x28a   :  { %427 = vmatpush.msrb.mxu3 %v386_v63  ;;  %v502_v63 = vld [vmem:[#allocation2 + $0x50] sm:$0xff] }
 0x28c   :  { %428 = vmatpush.msrb.mxu3 %v383_v60  ;;  %v503_v60 = vld [vmem:[#allocation2 + $0x58] sm:$0xff] }
 0x28d   :  { %564 = vmatpush.msrb.mxu0 %v503_v60 }
 0x28e   :  { %429 = vmatpush.msrb.mxu3 %v380_v51 }
 0x28f   :  { %565 = vmatpush.msrb.mxu0 %v502_v63 }
 0x290   :  { %430 = vmatpush.msrb.mxu3 %v377_v35 }
 0x291   :  { %566 = vmatpush.msrb.mxu0 %v501_v2 }
 0x292   :  { %431 = vmatpush.msrb.mxu3 %v374_v32 }
 0x293   :  { %567 = vmatpush.msrb.mxu0 %v500_v5 }
 0x294   :  { %432 = vmatpush.msrb.mxu3 %v371_v26 }
 0x296   :  { %433 = vmatpush.msrb.mxu3 %v368_v20 }
 0x297   :  { %434 = vmatmul.f32.vlgmr.msrb.gmra.mxu3 %v2990_v36 }
 0x29f   :  { %437 = vmatmul.f32.gmra.mxu3 %v2993_v37 }
 0x2a7   :  { %440 = vmatmul.f32.gmra.mxu3 %v2996_v38 }
 0x2af   :  { %443 = vmatmul.f32.gmra.mxu3 %v2999_v39 }
 0x2b7   :  { %446 = vmatmul.f32.gmra.mxu3 %v3002_v40 }
 0x2bf   :  { %449 = vmatmul.f32.gmra.mxu3 %v3005_v41 }
 0x2c7   :  { %452 = vmatmul.f32.gmra.mxu3 %v3008_v42 }
 0x2cf   :  { %455 = vmatmul.f32.gmra.mxu3 %v3011_v43 }
 0x2d7   :  { %458 = vmatmul.f32.gmra.mxu3 %v3014_v44 }
 0x2df   :  { %461 = vmatmul.f32.gmra.mxu3 %v3017_v45 }
 0x2e7   :  { %464 = vmatmul.f32.gmra.mxu3 %v3020_v46 }
 0x2ef   :  { %467 = vmatmul.f32.gmra.mxu3 %v3023_v47 }
 0x2f7   :  { %470 = vmatmul.f32.gmra.mxu3 %v3026_v50 }
 0x2ff   :  { %473 = vmatmul.f32.gmra.mxu3 %v3029_v53 }
 0x307   :  { %476 = vmatmul.f32.gmra.mxu3 %v3032_v54 }
 0x30f   :  { %479 = vmatmul.f32.gmra.mxu3 %v3035_v55 }
 0x31a   :  { %v435_v11 = vpop.f32.mrf.mxu3 }
 0x31b   :  { %v436_v14 = vadd.f32 %v2742_v8, %v435_v11 }
 0x31d   :  { %v483_v17 = vmax.f32 %v436_v14, 0.0 }
 0x31f   :  { %2576 = vmatmul.msk.f32.vlgmr.msrb.gmra.mxu0 %vm101_vm0, %v483_v17 }
 0x322   :  { %v438_v20 = vpop.f32.mrf.mxu3 }
 0x323   :  { %v439_v23 = vadd.f32 %v2742_v8, %v438_v20 }
 0x325   :  { %v484_v26 = vmax.f32 %v439_v23, 0.0 }
 0x327   :  { %2577 = vmatmul.msk.f32.gmra.mxu0 %vm101_vm0, %v484_v26 }
 0x32a   :  { %v441_v29 = vpop.f32.mrf.mxu3 }
 0x32b   :  { %v442_v56 = vadd.f32 %v2742_v8, %v441_v29 }
 0x32d   :  { %v485_v32 = vmax.f32 %v442_v56, 0.0 }
 0x32f   :  { %2578 = vmatmul.msk.f32.gmra.mxu0 %vm101_vm0, %v485_v32 }
 0x332   :  { %v444_v35 = vpop.f32.mrf.mxu3 }
 0x333   :  { %v445_v51 = vadd.f32 %v2742_v8, %v444_v35 }
 0x335   :  { %v486_v60 = vmax.f32 %v445_v51, 0.0 }
 0x337   :  { %2579 = vmatmul.msk.f32.gmra.mxu0 %vm101_vm0, %v486_v60 }
 0x33a   :  { %v447_v63 = vpop.f32.mrf.mxu3 }
 0x33b   :  { %v448_v2 = vadd.f32 %v2742_v8, %v447_v63 }
 0x33d   :  { %v487_v5 = vmax.f32 %v448_v2, 0.0 }
 0x33f   :  { %2580 = vmatmul.msk.f32.gmra.mxu0 %vm101_vm0, %v487_v5 }
 0x342   :  { %v450_v11 = vpop.f32.mrf.mxu3 }
 0x343   :  { %v451_v14 = vadd.f32 %v2742_v8, %v450_v11 }
 0x345   :  { %v488_v17 = vmax.f32 %v451_v14, 0.0 }
 0x347   :  { %2581 = vmatmul.msk.f32.gmra.mxu0 %vm101_vm0, %v488_v17 }
 0x34a   :  { %v453_v20 = vpop.f32.mrf.mxu3 }
 0x34b   :  { %v454_v23 = vadd.f32 %v2742_v8, %v453_v20 }
 0x34d   :  { %v489_v26 = vmax.f32 %v454_v23, 0.0 }
 0x34f   :  { %2582 = vmatmul.msk.f32.gmra.mxu0 %vm101_vm0, %v489_v26 }
 0x352   :  { %v456_v29 = vpop.f32.mrf.mxu3 }
 0x353   :  { %v457_v56 = vadd.f32 %v2742_v8, %v456_v29 }
 0x355   :  { %v490_v32 = vmax.f32 %v457_v56, 0.0 }
 0x357   :  { %2583 = vmatmul.msk.f32.gmra.mxu0 %vm101_vm0, %v490_v32 }
 0x35a   :  { %v459_v35 = vpop.f32.mrf.mxu3 }
 0x35b   :  { %v460_v51 = vadd.f32 %v2742_v8, %v459_v35 }
 0x35d   :  { %v491_v60 = vmax.f32 %v460_v51, 0.0 }
 0x35f   :  { %2584 = vmatmul.msk.f32.gmra.mxu0 %vm101_vm0, %v491_v60 }
 0x362   :  { %v462_v63 = vpop.f32.mrf.mxu3 }
 0x363   :  { %v463_v2 = vadd.f32 %v2742_v8, %v462_v63 }
 0x365   :  { %v492_v5 = vmax.f32 %v463_v2, 0.0 }
 0x367   :  { %2585 = vmatmul.msk.f32.gmra.mxu0 %vm101_vm0, %v492_v5 }
 0x36a   :  { %v465_v11 = vpop.f32.mrf.mxu3 }
 0x36b   :  { %v466_v14 = vadd.f32 %v2742_v8, %v465_v11 }
 0x36d   :  { %v493_v17 = vmax.f32 %v466_v14, 0.0 }
 0x36f   :  { %2586 = vmatmul.msk.f32.gmra.mxu0 %vm101_vm0, %v493_v17 }
 0x372   :  { %v468_v20 = vpop.f32.mrf.mxu3 }
 0x373   :  { %v469_v23 = vadd.f32 %v2742_v8, %v468_v20 }
 0x375   :  { %v494_v26 = vmax.f32 %v469_v23, 0.0 }
 0x377   :  { %2587 = vmatmul.msk.f32.gmra.mxu0 %vm101_vm0, %v494_v26 }
 0x37a   :  { %v471_v29 = vpop.f32.mrf.mxu3 }
 0x37b   :  { %v472_v56 = vadd.f32 %v2742_v8, %v471_v29 }
 0x37d   :  { %v495_v32 = vmax.f32 %v472_v56, 0.0 }
 0x37f   :  { %2588 = vmatmul.msk.f32.gmra.mxu0 %vm101_vm0, %v495_v32 }
 0x382   :  { %v474_v35 = vpop.f32.mrf.mxu3 }
 0x383   :  { %v475_v51 = vadd.f32 %v2742_v8, %v474_v35 }
 0x385   :  { %v496_v60 = vmax.f32 %v475_v51, 0.0 }
 0x387   :  { %2589 = vmatmul.msk.f32.gmra.mxu0 %vm101_vm0, %v496_v60 }
 0x38a   :  { %v477_v63 = vpop.f32.mrf.mxu3 }
 0x38b   :  { %v478_v2 = vadd.f32 %v2742_v8, %v477_v63 }
 0x38d   :  { %v497_v5 = vmax.f32 %v478_v2, 0.0 }
 0x38f   :  { %2590 = vmatmul.msk.f32.gmra.mxu0 %vm101_vm0, %v497_v5 }
 0x392   :  { %v480_v11 = vpop.f32.mrf.mxu3 }
 0x393   :  { %v481_v14 = vadd.f32 %v2742_v8, %v480_v11  ;;  %v3182_v8 = vld [vmem:[#allocation7 + $0xf2] ss:$0 sm:$0xff] }
 0x395   :  { %v498_v17 = vmax.f32 %v481_v14, 0.0 }
 0x397   :  { %2591 = vmatmul.msk.f32.gmra.mxu0 %vm101_vm0, %v498_v17 }
 0x39c   :  { %v569_v20 = vpop.f32.mrf.mxu0 }
 0x3a4   :  { %v572_v23 = vpop.f32.mrf.mxu0 }
 0x3ac   :  { %v575_v26 = vpop.f32.mrf.mxu0 }
 0x3b4   :  { %v578_v29 = vpop.f32.mrf.mxu0 }
 0x3bc   :  { %v581_v56 = vpop.f32.mrf.mxu0 }
 0x3c4   :  { %v584_v32 = vpop.f32.mrf.mxu0 }
 0x3cc   :  { %v587_v35 = vpop.f32.mrf.mxu0 }
 0x3d4   :  { %v590_v51 = vpop.f32.mrf.mxu0 }
 0x3dc   :  { %v593_v57 = vpop.f32.mrf.mxu0 }
 0x3e4   :  { %v596_v60 = vpop.f32.mrf.mxu0 }
 0x3ec   :  { %v599_v49 = vpop.f32.mrf.mxu0 }
 0x3f4   :  { %v602_v63 = vpop.f32.mrf.mxu0 }
 0x3fc   :  { %v605_v2 = vpop.f32.mrf.mxu0 }
 0x404   :  { %v608_v34 = vpop.f32.mrf.mxu0 }
 0x40c   :  { %v611_v5 = vpop.f32.mrf.mxu0 }
 0x414   :  { %v614_v31 = vpop.f32.mrf.mxu0 }
 0x415   :  { %619 = vmatpush.msrb.mxu2 %v614_v31  ;;  %v720_v31 = vld [vmem:[#allocation2 + $0x78] sm:$0xff] }
 0x416   :  { %781 = vmatpush.msra.mxu1 %v720_v31 }
 0x417   :  { %620 = vmatpush.msrb.mxu2 %v611_v5 }
 0x419   :  { %621 = vmatpush.msrb.mxu2 %v608_v34  ;;  %v719_v34 = vld [vmem:[#allocation2 + $0x70] sm:$0xff] }
 0x41a   :  { %782 = vmatpush.msra.mxu1 %v719_v34 }
 0x41b   :  { %622 = vmatpush.msrb.mxu2 %v605_v2 }
 0x41d   :  { %623 = vmatpush.msrb.mxu2 %v602_v63 }
 0x41f   :  { %624 = vmatpush.msrb.mxu2 %v599_v49  ;;  %v718_v49 = vld [vmem:[#allocation2 + $0x68] sm:$0xff] }
 0x420   :  { %783 = vmatpush.msra.mxu1 %v718_v49 }
 0x421   :  { %625 = vmatpush.msrb.mxu2 %v596_v60 }
 0x423   :  { %626 = vmatpush.msrb.mxu2 %v593_v57  ;;  %v717_v57 = vld [vmem:[#allocation2 + $0x60] sm:$0xff] }
 0x424   :  { %784 = vmatpush.msra.mxu1 %v717_v57 }
 0x425   :  { %627 = vmatpush.msrb.mxu2 %v590_v51 }
 0x427   :  { %628 = vmatpush.msrb.mxu2 %v587_v35 }
 0x429   :  { %629 = vmatpush.msrb.mxu2 %v584_v32 }
 0x42b   :  { %630 = vmatpush.msrb.mxu2 %v581_v56 }
 0x42d   :  { %631 = vmatpush.msrb.mxu2 %v578_v29 }
 0x42f   :  { %632 = vmatpush.msrb.mxu2 %v575_v26 }
 0x431   :  { %633 = vmatpush.msrb.mxu2 %v572_v23 }
 0x433   :  { %634 = vmatpush.msrb.mxu2 %v569_v20 }
 0x434   :  { %635 = vmatmul.f32.vlgmr.msrb.gmra.mxu2 %v2990_v36 }
 0x43c   :  { %638 = vmatmul.f32.gmra.mxu2 %v2993_v37 }
 0x444   :  { %641 = vmatmul.f32.gmra.mxu2 %v2996_v38 }
 0x44c   :  { %644 = vmatmul.f32.gmra.mxu2 %v2999_v39 }
 0x454   :  { %647 = vmatmul.f32.gmra.mxu2 %v3002_v40 }
 0x45c   :  { %650 = vmatmul.f32.gmra.mxu2 %v3005_v41 }
 0x464   :  { %653 = vmatmul.f32.gmra.mxu2 %v3008_v42 }
 0x46c   :  { %656 = vmatmul.f32.gmra.mxu2 %v3011_v43 }
 0x474   :  { %659 = vmatmul.f32.gmra.mxu2 %v3014_v44 }
 0x47c   :  { %662 = vmatmul.f32.gmra.mxu2 %v3017_v45 }
 0x484   :  { %665 = vmatmul.f32.gmra.mxu2 %v3020_v46 }
 0x48c   :  { %668 = vmatmul.f32.gmra.mxu2 %v3023_v47 }
 0x494   :  { %671 = vmatmul.f32.gmra.mxu2 %v3026_v50 }
 0x49c   :  { %674 = vmatmul.f32.gmra.mxu2 %v3029_v53 }
 0x4a4   :  { %677 = vmatmul.f32.gmra.mxu2 %v3032_v54 }
 0x4ac   :  { %680 = vmatmul.f32.gmra.mxu2 %v3035_v55 }
 0x4b7   :  { %v636_v11 = vpop.f32.mrf.mxu2 }
 0x4b8   :  { %v637_v14 = vadd.f32 %v3182_v8, %v636_v11 }
 0x4ba   :  { %v3187_v17 = vadd.f32 %v637_v14, %v282_v59 }
 0x4bc   :  { %v700_v20 = vmax.f32 %v3187_v17, 0.0 }
 0x4be   :  { %2592 = vmatmul.msk.f32.vlgmr.msra.gmra.mxu1 %vm101_vm0, %v700_v20 }
 0x4bf   :  { %v639_v23 = vpop.f32.mrf.mxu2 }
 0x4c0   :  { %v640_v26 = vadd.f32 %v3182_v8, %v639_v23 }
 0x4c2   :  { %v3196_v29 = vadd.f32 %v640_v26, %v283_v62 }
 0x4c4   :  { %v701_v56 = vmax.f32 %v3196_v29, 0.0 }
 0x4c6   :  { %2593 = vmatmul.msk.f32.gmra.mxu1 %vm101_vm0, %v701_v56 }
 0x4c7   :  { %v642_v58 = vpop.f32.mrf.mxu2 }
 0x4c8   :  { %v643_v59 = vadd.f32 %v3182_v8, %v642_v58 }
 0x4ca   :  { %v3205_v32 = vadd.f32 %v643_v59, %v284_v1 }
 0x4cc   :  { %v702_v35 = vmax.f32 %v3205_v32, 0.0 }
 0x4ce   :  { %2594 = vmatmul.msk.f32.gmra.mxu1 %vm101_vm0, %v702_v35 }
 0x4cf   :  { %v645_v61 = vpop.f32.mrf.mxu2 }
 0x4d0   :  { %v646_v62 = vadd.f32 %v3182_v8, %v645_v61 }
 0x4d2   :  { %v3214_v51 = vadd.f32 %v646_v62, %v285_v4 }
 0x4d4   :  { %v703_v60 = vmax.f32 %v3214_v51, 0.0 }
 0x4d6   :  { %2595 = vmatmul.msk.f32.gmra.mxu1 %vm101_vm0, %v703_v60 }
 0x4d7   :  { %v648_v0 = vpop.f32.mrf.mxu2 }
 0x4d8   :  { %v649_v1 = vadd.f32 %v3182_v8, %v648_v0 }
 0x4da   :  { %v3223_v63 = vadd.f32 %v649_v1, %v286_v7  ;;  %v4124_v1 = vmax.f32 %v3110_v30, 0.0 }
 0x4dc   :  { %v704_v2 = vmax.f32 %v3223_v63, 0.0 }
 0x4de   :  { %2596 = vmatmul.msk.f32.gmra.mxu1 %vm101_vm0, %v704_v2 }
 0x4df   :  { %v651_v3 = vpop.f32.mrf.mxu2 }
 0x4e0   :  { %v652_v4 = vadd.f32 %v3182_v8, %v651_v3 }
 0x4e2   :  { %v3232_v5 = vadd.f32 %v652_v4, %v287_v10 }
 0x4e4   :  { %v705_v31 = vmax.f32 %v3232_v5, 0.0 }
 0x4e6   :  { %2597 = vmatmul.msk.f32.gmra.mxu1 %vm101_vm0, %v705_v31 }
 0x4e7   :  { %v654_v6 = vpop.f32.mrf.mxu2 }
 0x4e8   :  { %v655_v7 = vadd.f32 %v3182_v8, %v654_v6  ;;  %v4125_v6 = vmax.f32 %v3116_v33, 0.0 }
 0x4ea   :  { %v3241_v34 = vadd.f32 %v655_v7, %v288_v13 }
 0x4ec   :  { %v706_v49 = vmax.f32 %v3241_v34, 0.0 }
 0x4ee   :  { %2598 = vmatmul.msk.f32.gmra.mxu1 %vm101_vm0, %v706_v49 }
 0x4ef   :  { %v657_v9 = vpop.f32.mrf.mxu2 }
 0x4f0   :  { %v658_v10 = vadd.f32 %v3182_v8, %v657_v9 }
 0x4f2   :  { %v3250_v57 = vadd.f32 %v658_v10, %v289_v16 }
 0x4f4   :  { %v707_v11 = vmax.f32 %v3250_v57, 0.0 }
 0x4f6   :  { %2599 = vmatmul.msk.f32.gmra.mxu1 %vm101_vm0, %v707_v11 }
 0x4f7   :  { %v660_v12 = vpop.f32.mrf.mxu2 }
 0x4f8   :  { %v661_v13 = vadd.f32 %v3182_v8, %v660_v12  ;;  %v4126_v12 = vmax.f32 %v3122_v48, 0.0 }
 0x4fa   :  { %v3259_v14 = vadd.f32 %v661_v13, %v290_v19 }
 0x4fc   :  { %v708_v23 = vmax.f32 %v3259_v14, 0.0 }
 0x4fe   :  { %2600 = vmatmul.msk.f32.gmra.mxu1 %vm101_vm0, %v708_v23 }
 0x4ff   :  { %v663_v15 = vpop.f32.mrf.mxu2 }
 0x500   :  { %v664_v16 = vadd.f32 %v3182_v8, %v663_v15 }
 0x502   :  { %v3268_v26 = vadd.f32 %v664_v16, %v291_v22 }
 0x504   :  { %v709_v58 = vmax.f32 %v3268_v26, 0.0 }
 0x506   :  { %2601 = vmatmul.msk.f32.gmra.mxu1 %vm101_vm0, %v709_v58 }
 0x507   :  { %v666_v18 = vpop.f32.mrf.mxu2 }
 0x508   :  { %v667_v19 = vadd.f32 %v3182_v8, %v666_v18  ;;  %v4127_v18 = vmax.f32 %v3128_v52, 0.0 }
 0x50a   :  { %v3277_v59 = vadd.f32 %v667_v19, %v292_v25 }
 0x50c   :  { %v710_v61 = vmax.f32 %v3277_v59, 0.0 }
 0x50e   :  { %2602 = vmatmul.msk.f32.gmra.mxu1 %vm101_vm0, %v710_v61 }
 0x50f   :  { %v669_v21 = vpop.f32.mrf.mxu2 }
 0x510   :  { %v670_v22 = vadd.f32 %v3182_v8, %v669_v21 }
 0x512   :  { %v3286_v62 = vadd.f32 %v670_v22, %v293_v28 }
 0x514   :  { %v711_v0 = vmax.f32 %v3286_v62, 0.0 }
 0x516   :  { %2603 = vmatmul.msk.f32.gmra.mxu1 %vm101_vm0, %v711_v0 }
 0x517   :  { %v672_v24 = vpop.f32.mrf.mxu2 }
 0x518   :  { %v673_v25 = vadd.f32 %v3182_v8, %v672_v24 }
 0x51a   :  { %v3295_v3 = vadd.f32 %v673_v25, %v4124_v1 }
 0x51c   :  { %v712_v4 = vmax.f32 %v3295_v3, 0.0 }
 0x51e   :  { %2604 = vmatmul.msk.f32.gmra.mxu1 %vm101_vm0, %v712_v4 }
 0x51f   :  { %v675_v27 = vpop.f32.mrf.mxu2 }
 0x520   :  { %v676_v28 = vadd.f32 %v3182_v8, %v675_v27 }
 0x522   :  { %v3304_v7 = vadd.f32 %v676_v28, %v4125_v6 }
 0x524   :  { %v713_v9 = vmax.f32 %v3304_v7, 0.0 }
 0x526   :  { %2605 = vmatmul.msk.f32.gmra.mxu1 %vm101_vm0, %v713_v9 }
 0x527   :  { %v678_v30 = vpop.f32.mrf.mxu2 }
 0x528   :  { %v679_v10 = vadd.f32 %v3182_v8, %v678_v30 }
 0x52a   :  { %v3313_v13 = vadd.f32 %v679_v10, %v4126_v12 }
 0x52c   :  { %v714_v15 = vmax.f32 %v3313_v13, 0.0 }
 0x52e   :  { %2606 = vmatmul.msk.f32.gmra.mxu1 %vm101_vm0, %v714_v15 }
 0x52f   :  { %v681_v33 = vpop.f32.mrf.mxu2 }
 0x530   :  { %v682_v16 = vadd.f32 %v3182_v8, %v681_v33 }
 0x532   :  { %v3322_v19 = vadd.f32 %v682_v16, %v4127_v18 }
 0x534   :  { %v715_v21 = vmax.f32 %v3322_v19, 0.0 }
 0x536   :  { %2607 = vmatmul.msk.f32.gmra.mxu1 %vm101_vm0, %v715_v21 }
 0x53b   :  { %v786_v48 = vpop.f32.mrf.mxu1 }
 0x543   :  { %v789_v22 = vpop.f32.mrf.mxu1 }
 0x54b   :  { %v792_v24 = vpop.f32.mrf.mxu1 }
 0x553   :  { %v795_v25 = vpop.f32.mrf.mxu1 }
 0x55b   :  { %v798_v1 = vpop.f32.mrf.mxu1 }
 0x563   :  { %v801_v27 = vpop.f32.mrf.mxu1 }
 0x56b   :  { %v804_v28 = vpop.f32.mrf.mxu1 }
 0x573   :  { %v807_v6 = vpop.f32.mrf.mxu1 }
 0x57b   :  { %v810_v30 = vpop.f32.mrf.mxu1 }
 0x583   :  { %v813_v8 = vpop.f32.mrf.mxu1 }
 0x58b   :  { %v816_v10 = vpop.f32.mrf.mxu1 }
 0x593   :  { %v819_v52 = vpop.f32.mrf.mxu1 }
 0x59b   :  { %v822_v12 = vpop.f32.mrf.mxu1 }
 0x5a3   :  { %v825_v33 = vpop.f32.mrf.mxu1 }
 0x5ab   :  { %v828_v16 = vpop.f32.mrf.mxu1 }
 0x5b3   :  { %v831_v18 = vpop.f32.mrf.mxu1 }
 0x5b4   :  { %836 = vmatpush.msra.mxu3 %v831_v18 }
 0x5b6   :  { %837 = vmatpush.msra.mxu3 %v828_v16 }
 0x5b8   :  { %838 = vmatpush.msra.mxu3 %v825_v33 }
 0x5ba   :  { %839 = vmatpush.msra.mxu3 %v822_v12 }
 0x5bc   :  { %840 = vmatpush.msra.mxu3 %v819_v52 }
 0x5be   :  { %841 = vmatpush.msra.mxu3 %v816_v10 }
 0x5c0   :  { %842 = vmatpush.msra.mxu3 %v813_v8 }
 0x5c2   :  { %843 = vmatpush.msra.mxu3 %v810_v30 }
 0x5c4   :  { %844 = vmatpush.msra.mxu3 %v807_v6 }
 0x5c6   :  { %845 = vmatpush.msra.mxu3 %v804_v28 }
 0x5c8   :  { %846 = vmatpush.msra.mxu3 %v801_v27 }
 0x5ca   :  { %847 = vmatpush.msra.mxu3 %v798_v1 }
 0x5cc   :  { %848 = vmatpush.msra.mxu3 %v795_v25 }
 0x5ce   :  { %849 = vmatpush.msra.mxu3 %v792_v24 }
 0x5d0   :  { %850 = vmatpush.msra.mxu3 %v789_v22 }
 0x5d2   :  { %851 = vmatpush.msra.mxu3 %v786_v48  ;;  %v921_v48 = vld [vmem:[#allocation2 + $0x98] sm:$0xff] }
 0x5d3   :  { %852 = vmatmul.f32.vlgmr.msra.gmra.mxu3 %v2990_v36  ;;  %982 = vmatpush.msra.mxu0 %v921_v48  ;;  %v920_v36 = vld [vmem:[#allocation2 + $0x90] sm:$0xff] }
 0x5d5   :  { %983 = vmatpush.msra.mxu0 %v920_v36 }
 0x5db   :  { %855 = vmatmul.f32.gmra.mxu3 %v2993_v37  ;;  %v919_v37 = vld [vmem:[#allocation2 + $0x88] sm:$0xff] }
 0x5dc   :  { %984 = vmatpush.msra.mxu0 %v919_v37 }
 0x5e3   :  { %858 = vmatmul.f32.gmra.mxu3 %v2996_v38  ;;  %v918_v38 = vld [vmem:[#allocation2 + $0x80] sm:$0xff] }
 0x5e4   :  { %985 = vmatpush.msra.mxu0 %v918_v38 }
 0x5eb   :  { %861 = vmatmul.f32.gmra.mxu3 %v2999_v39  ;;  %v2744_v39 = vld [vmem:[#allocation7 + $0xf3] ss:$0 sm:$0xff] }
 0x5f3   :  { %864 = vmatmul.f32.gmra.mxu3 %v3002_v40 }
 0x5fb   :  { %867 = vmatmul.f32.gmra.mxu3 %v3005_v41 }
 0x603   :  { %870 = vmatmul.f32.gmra.mxu3 %v3008_v42 }
 0x60b   :  { %873 = vmatmul.f32.gmra.mxu3 %v3011_v43 }
 0x613   :  { %876 = vmatmul.f32.gmra.mxu3 %v3014_v44 }
 0x61b   :  { %879 = vmatmul.f32.gmra.mxu3 %v3017_v45 }
 0x623   :  { %882 = vmatmul.f32.gmra.mxu3 %v3020_v46 }
 0x62b   :  { %885 = vmatmul.f32.gmra.mxu3 %v3023_v47 }
 0x633   :  { %888 = vmatmul.f32.gmra.mxu3 %v3026_v50 }
 0x63b   :  { %891 = vmatmul.f32.gmra.mxu3 %v3029_v53 }
 0x643   :  { %894 = vmatmul.f32.gmra.mxu3 %v3032_v54 }
 0x64b   :  { %897 = vmatmul.f32.gmra.mxu3 %v3035_v55 }
 0x656   :  { %v853_v40 = vpop.f32.mrf.mxu3 }
 0x657   :  { %v854_v41 = vadd.f32 %v2744_v39, %v853_v40 }
 0x659   :  { %v901_v42 = vmax.f32 %v854_v41, 0.0 }
 0x65b   :  { %2608 = vmatmul.msk.f32.vlgmr.msra.gmra.mxu0 %vm101_vm0, %v901_v42 }
 0x65e   :  { %v856_v43 = vpop.f32.mrf.mxu3 }
 0x65f   :  { %v857_v44 = vadd.f32 %v2744_v39, %v856_v43 }
 0x661   :  { %v902_v46 = vmax.f32 %v857_v44, 0.0 }
 0x663   :  { %2609 = vmatmul.msk.f32.gmra.mxu0 %vm101_vm0, %v902_v46 }
 0x666   :  { %v859_v22 = vpop.f32.mrf.mxu3 }
 0x667   :  { %v860_v24 = vadd.f32 %v2744_v39, %v859_v22 }
 0x669   :  { %v903_v25 = vmax.f32 %v860_v24, 0.0 }
 0x66b   :  { %2610 = vmatmul.msk.f32.gmra.mxu0 %vm101_vm0, %v903_v25 }
 0x66e   :  { %v862_v1 = vpop.f32.mrf.mxu3 }
 0x66f   :  { %v863_v27 = vadd.f32 %v2744_v39, %v862_v1 }
 0x671   :  { %v904_v28 = vmax.f32 %v863_v27, 0.0 }
 0x673   :  { %2611 = vmatmul.msk.f32.gmra.mxu0 %vm101_vm0, %v904_v28 }
 0x676   :  { %v865_v6 = vpop.f32.mrf.mxu3 }
 0x677   :  { %v866_v30 = vadd.f32 %v2744_v39, %v865_v6 }
 0x679   :  { %v905_v8 = vmax.f32 %v866_v30, 0.0 }
 0x67b   :  { %2612 = vmatmul.msk.f32.gmra.mxu0 %vm101_vm0, %v905_v8 }
 0x67e   :  { %v868_v10 = vpop.f32.mrf.mxu3 }
 0x67f   :  { %v869_v52 = vadd.f32 %v2744_v39, %v868_v10 }
 0x681   :  { %v906_v12 = vmax.f32 %v869_v52, 0.0 }
 0x683   :  { %2613 = vmatmul.msk.f32.gmra.mxu0 %vm101_vm0, %v906_v12 }
 0x686   :  { %v871_v33 = vpop.f32.mrf.mxu3 }
 0x687   :  { %v872_v16 = vadd.f32 %v2744_v39, %v871_v33 }
 0x689   :  { %v907_v18 = vmax.f32 %v872_v16, 0.0 }
 0x68b   :  { %2614 = vmatmul.msk.f32.gmra.mxu0 %vm101_vm0, %v907_v18 }
 0x68e   :  { %v874_v48 = vpop.f32.mrf.mxu3 }
 0x68f   :  { %v875_v36 = vadd.f32 %v2744_v39, %v874_v48 }
 0x691   :  { %v908_v37 = vmax.f32 %v875_v36, 0.0 }
 0x693   :  { %2615 = vmatmul.msk.f32.gmra.mxu0 %vm101_vm0, %v908_v37 }
 0x696   :  { %v877_v38 = vpop.f32.mrf.mxu3 }
 0x697   :  { %v878_v40 = vadd.f32 %v2744_v39, %v877_v38 }
 0x699   :  { %v909_v41 = vmax.f32 %v878_v40, 0.0 }
 0x69b   :  { %2616 = vmatmul.msk.f32.gmra.mxu0 %vm101_vm0, %v909_v41 }
 0x69e   :  { %v880_v42 = vpop.f32.mrf.mxu3 }
 0x69f   :  { %v881_v43 = vadd.f32 %v2744_v39, %v880_v42 }
 0x6a1   :  { %v910_v44 = vmax.f32 %v881_v43, 0.0 }
 0x6a3   :  { %2617 = vmatmul.msk.f32.gmra.mxu0 %vm101_vm0, %v910_v44 }
 0x6a6   :  { %v883_v46 = vpop.f32.mrf.mxu3 }
 0x6a7   :  { %v884_v22 = vadd.f32 %v2744_v39, %v883_v46 }
 0x6a9   :  { %v911_v24 = vmax.f32 %v884_v22, 0.0 }
 0x6ab   :  { %2618 = vmatmul.msk.f32.gmra.mxu0 %vm101_vm0, %v911_v24 }
 0x6ae   :  { %v886_v25 = vpop.f32.mrf.mxu3 }
 0x6af   :  { %v887_v1 = vadd.f32 %v2744_v39, %v886_v25 }
 0x6b1   :  { %v912_v27 = vmax.f32 %v887_v1, 0.0 }
 0x6b3   :  { %2619 = vmatmul.msk.f32.gmra.mxu0 %vm101_vm0, %v912_v27 }
 0x6b6   :  { %v889_v28 = vpop.f32.mrf.mxu3 }
 0x6b7   :  { %v890_v6 = vadd.f32 %v2744_v39, %v889_v28 }
 0x6b9   :  { %v913_v30 = vmax.f32 %v890_v6, 0.0 }
 0x6bb   :  { %2620 = vmatmul.msk.f32.gmra.mxu0 %vm101_vm0, %v913_v30 }
 0x6be   :  { %v892_v8 = vpop.f32.mrf.mxu3 }
 0x6bf   :  { %v893_v10 = vadd.f32 %v2744_v39, %v892_v8  ;;  %v3363_v8 = vld [vmem:[#allocation7 + $0x8] sm:$0xff] }
 0x6c1   :  { %v914_v52 = vmax.f32 %v893_v10, 0.0  ;;  %v3366_v10 = vld [vmem:[#allocation7 + $0x10] sm:$0xff] }
 0x6c3   :  { %2621 = vmatmul.msk.f32.gmra.mxu0 %vm101_vm0, %v914_v52  ;;  %v3369_v52 = vld [vmem:[#allocation7 + $0x18] sm:$0xff] }
 0x6c6   :  { %v895_v12 = vpop.f32.mrf.mxu3 }
 0x6c7   :  { %v896_v33 = vadd.f32 %v2744_v39, %v895_v12  ;;  %v3372_v12 = vld [vmem:[#allocation7 + $0x20] sm:$0xff] }
 0x6c9   :  { %v915_v16 = vmax.f32 %v896_v33, 0.0  ;;  %v3375_v33 = vld [vmem:[#allocation7 + $0x28] sm:$0xff] }
 0x6cb   :  { %2622 = vmatmul.msk.f32.gmra.mxu0 %vm101_vm0, %v915_v16  ;;  %v3378_v16 = vld [vmem:[#allocation7 + $0x30] sm:$0xff] }
 0x6ce   :  { %v898_v18 = vpop.f32.mrf.mxu3 }
 0x6cf   :  { %v899_v48 = vadd.f32 %v2744_v39, %v898_v18  ;;  %v3360_v39 = vld [vmem:[#allocation7] sm:$0xff]  ;;  %v3381_v18 = vld [vmem:[#allocation7 + $0x38] sm:$0xff] }
 0x6d1   :  { %v916_v36 = vmax.f32 %v899_v48, 0.0  ;;  %v3384_v48 = vld [vmem:[#allocation7 + $0x40] sm:$0xff] }
 0x6d3   :  { %2623 = vmatmul.msk.f32.gmra.mxu0 %vm101_vm0, %v916_v36  ;;  %v1138_v36 = vld [vmem:[#allocation2 + $0xb8] sm:$0xff] }
 0x6d4   :  { %1199 = vmatpush.msrb.mxu1 %v1138_v36 }
 0x6d8   :  { %v987_v37 = vpop.f32.mrf.mxu0 }
 0x6e0   :  { %v990_v38 = vpop.f32.mrf.mxu0 }
 0x6e8   :  { %v993_v40 = vpop.f32.mrf.mxu0 }
 0x6f0   :  { %v996_v41 = vpop.f32.mrf.mxu0 }
 0x6f8   :  { %v999_v42 = vpop.f32.mrf.mxu0 }
 0x700   :  { %v1002_v43 = vpop.f32.mrf.mxu0 }
 0x708   :  { %v1005_v44 = vpop.f32.mrf.mxu0 }
 0x710   :  { %v1008_v46 = vpop.f32.mrf.mxu0 }
 0x718   :  { %v1011_v22 = vpop.f32.mrf.mxu0 }
 0x720   :  { %v1014_v24 = vpop.f32.mrf.mxu0 }
 0x728   :  { %v1017_v25 = vpop.f32.mrf.mxu0 }
 0x730   :  { %v1020_v1 = vpop.f32.mrf.mxu0 }
 0x738   :  { %v1023_v27 = vpop.f32.mrf.mxu0 }
 0x740   :  { %v1026_v28 = vpop.f32.mrf.mxu0 }
 0x748   :  { %v1029_v6 = vpop.f32.mrf.mxu0 }
 0x750   :  { %v1032_v30 = vpop.f32.mrf.mxu0 }
 0x751   :  { %1037 = vmatpush.msra.mxu2 %v1032_v30 }
 0x753   :  { %1038 = vmatpush.msra.mxu2 %v1029_v6 }
 0x755   :  { %1039 = vmatpush.msra.mxu2 %v1026_v28 }
 0x757   :  { %1040 = vmatpush.msra.mxu2 %v1023_v27 }
 0x759   :  { %1041 = vmatpush.msra.mxu2 %v1020_v1 }
 0x75b   :  { %1042 = vmatpush.msra.mxu2 %v1017_v25 }
 0x75d   :  { %1043 = vmatpush.msra.mxu2 %v1014_v24 }
 0x75f   :  { %1044 = vmatpush.msra.mxu2 %v1011_v22 }
 0x761   :  { %1045 = vmatpush.msra.mxu2 %v1008_v46 }
 0x763   :  { %1046 = vmatpush.msra.mxu2 %v1005_v44 }
 0x765   :  { %1047 = vmatpush.msra.mxu2 %v1002_v43 }
 0x767   :  { %1048 = vmatpush.msra.mxu2 %v999_v42 }
 0x769   :  { %1049 = vmatpush.msra.mxu2 %v996_v41  ;;  %v1135_v41 = vld [vmem:[#allocation2 + $0xa0] sm:$0xff] }
 0x76b   :  { %1050 = vmatpush.msra.mxu2 %v993_v40  ;;  %v1136_v40 = vld [vmem:[#allocation2 + $0xa8] sm:$0xff] }
 0x76d   :  { %1051 = vmatpush.msra.mxu2 %v990_v38  ;;  %v1137_v38 = vld [vmem:[#allocation2 + $0xb0] sm:$0xff] }
 0x76e   :  { %1200 = vmatpush.msrb.mxu1 %v1137_v38 }
 0x76f   :  { %1052 = vmatpush.msra.mxu2 %v987_v37  ;;  %v3388_v37 = vld [vmem:[#allocation7 + $0x50] sm:$0xff] }
 0x770   :  { %1053 = vmatmul.f32.vlgmr.msra.gmra.mxu2 %v3360_v39  ;;  %1201 = vmatpush.msrb.mxu1 %v1136_v40 }
 0x772   :  { %1202 = vmatpush.msrb.mxu1 %v1135_v41 }
 0x778   :  { %1056 = vmatmul.f32.gmra.mxu2 %v3363_v8 }
 0x780   :  { %1059 = vmatmul.f32.gmra.mxu2 %v3366_v10 }
 0x788   :  { %1062 = vmatmul.f32.gmra.mxu2 %v3369_v52 }
 0x790   :  { %1065 = vmatmul.f32.gmra.mxu2 %v3372_v12 }
 0x798   :  { %1068 = vmatmul.f32.gmra.mxu2 %v3375_v33 }
 0x7a0   :  { %1071 = vmatmul.f32.gmra.mxu2 %v3378_v16 }
 0x7a8   :  { %1074 = vmatmul.f32.gmra.mxu2 %v3381_v18 }
 0x7b0   :  { %1077 = vmatmul.f32.gmra.mxu2 %v3384_v48 }
 0x7b8   :  { %1080 = vmatmul.f32.gmra.mxu2 %v3017_v45  ;;  %v3396_v45 = vld [vmem:[#allocation7 + $0xf4] ss:$0 sm:$0xff] }
 0x7c0   :  { %1083 = vmatmul.f32.gmra.mxu2 %v3388_v37 }
 0x7c8   :  { %1086 = vmatmul.f32.gmra.mxu2 %v3023_v47 }
 0x7d0   :  { %1089 = vmatmul.f32.gmra.mxu2 %v3026_v50 }
 0x7d8   :  { %1092 = vmatmul.f32.gmra.mxu2 %v3029_v53 }
 0x7e0   :  { %1095 = vmatmul.f32.gmra.mxu2 %v3032_v54 }
 0x7e8   :  { %1098 = vmatmul.f32.gmra.mxu2 %v3035_v55 }
 0x7f3   :  { %v1054_v42 = vpop.f32.mrf.mxu2 }
 0x7f4   :  { %v1055_v43 = vadd.f32 %v3396_v45, %v1054_v42 }
 0x7f6   :  { %v3401_v47 = vadd.f32 %v1055_v43, %v700_v20 }
 0x7f8   :  { %v1118_v50 = vmax.f32 %v3401_v47, 0.0 }
 0x7fa   :  { %2624 = vmatmul.msk.f32.vlgmr.msrb.gmra.mxu1 %vm101_vm0, %v1118_v50 }
 0x7fb   :  { %v1057_v53 = vpop.f32.mrf.mxu2 }
 0x7fc   :  { %v1058_v54 = vadd.f32 %v3396_v45, %v1057_v53 }
 0x7fe   :  { %v3410_v55 = vadd.f32 %v1058_v54, %v701_v56 }
 0x800   :  { %v1119_v44 = vmax.f32 %v3410_v55, 0.0 }
 0x802   :  { %2625 = vmatmul.msk.f32.gmra.mxu1 %vm101_vm0, %v1119_v44 }
 0x803   :  { %v1060_v17 = vpop.f32.mrf.mxu2 }
 0x804   :  { %v1061_v20 = vadd.f32 %v3396_v45, %v1060_v17 }
 0x806   :  { %v3419_v46 = vadd.f32 %v1061_v20, %v702_v35 }
 0x808   :  { %v1120_v22 = vmax.f32 %v3419_v46, 0.0 }
 0x80a   :  { %2626 = vmatmul.msk.f32.gmra.mxu1 %vm101_vm0, %v1120_v22 }
 0x80b   :  { %v1063_v29 = vpop.f32.mrf.mxu2 }
 0x80c   :  { %v1064_v56 = vadd.f32 %v3396_v45, %v1063_v29 }
 0x80e   :  { %v3428_v24 = vadd.f32 %v1064_v56, %v703_v60 }
 0x810   :  { %v1121_v25 = vmax.f32 %v3428_v24, 0.0 }
 0x812   :  { %2627 = vmatmul.msk.f32.gmra.mxu1 %vm101_vm0, %v1121_v25 }
 0x813   :  { %v1066_v32 = vpop.f32.mrf.mxu2 }
 0x814   :  { %v1067_v35 = vadd.f32 %v3396_v45, %v1066_v32 }
 0x816   :  { %v3437_v1 = vadd.f32 %v1067_v35, %v704_v2 }
 0x818   :  { %v1122_v27 = vmax.f32 %v3437_v1, 0.0 }
 0x81a   :  { %2628 = vmatmul.msk.f32.gmra.mxu1 %vm101_vm0, %v1122_v27 }
 0x81b   :  { %v1069_v51 = vpop.f32.mrf.mxu2 }
 0x81c   :  { %v1070_v60 = vadd.f32 %v3396_v45, %v1069_v51 }
 0x81e   :  { %v3446_v28 = vadd.f32 %v1070_v60, %v705_v31 }
 0x820   :  { %v1123_v6 = vmax.f32 %v3446_v28, 0.0 }
 0x822   :  { %2629 = vmatmul.msk.f32.gmra.mxu1 %vm101_vm0, %v1123_v6 }
 0x823   :  { %v1072_v63 = vpop.f32.mrf.mxu2 }
 0x824   :  { %v1073_v2 = vadd.f32 %v3396_v45, %v1072_v63 }
 0x826   :  { %v3455_v30 = vadd.f32 %v1073_v2, %v706_v49 }
 0x828   :  { %v1124_v36 = vmax.f32 %v3455_v30, 0.0 }
 0x82a   :  { %2630 = vmatmul.msk.f32.gmra.mxu1 %vm101_vm0, %v1124_v36 }
 0x82b   :  { %v1075_v5 = vpop.f32.mrf.mxu2 }
 0x82c   :  { %v1076_v31 = vadd.f32 %v3396_v45, %v1075_v5 }
 0x82e   :  { %v3464_v38 = vadd.f32 %v1076_v31, %v707_v11 }
 0x830   :  { %v1125_v40 = vmax.f32 %v3464_v38, 0.0 }
 0x832   :  { %2631 = vmatmul.msk.f32.gmra.mxu1 %vm101_vm0, %v1125_v40 }
 0x833   :  { %v1078_v34 = vpop.f32.mrf.mxu2 }
 0x834   :  { %v1079_v49 = vadd.f32 %v3396_v45, %v1078_v34 }
 0x836   :  { %v3473_v41 = vadd.f32 %v1079_v49, %v708_v23 }
 0x838   :  { %v1126_v42 = vmax.f32 %v3473_v41, 0.0 }
 0x83a   :  { %2632 = vmatmul.msk.f32.gmra.mxu1 %vm101_vm0, %v1126_v42 }
 0x83b   :  { %v1081_v57 = vpop.f32.mrf.mxu2 }
 0x83c   :  { %v1082_v11 = vadd.f32 %v3396_v45, %v1081_v57 }
 0x83e   :  { %v3482_v43 = vadd.f32 %v1082_v11, %v709_v58 }
 0x840   :  { %v1127_v53 = vmax.f32 %v3482_v43, 0.0 }
 0x842   :  { %2633 = vmatmul.msk.f32.gmra.mxu1 %vm101_vm0, %v1127_v53 }
 0x843   :  { %v1084_v14 = vpop.f32.mrf.mxu2 }
 0x844   :  { %v1085_v23 = vadd.f32 %v3396_v45, %v1084_v14 }
 0x846   :  { %v3491_v54 = vadd.f32 %v1085_v23, %v710_v61 }
 0x848   :  { %v1128_v17 = vmax.f32 %v3491_v54, 0.0 }
 0x84a   :  { %2634 = vmatmul.msk.f32.gmra.mxu1 %vm101_vm0, %v1128_v17 }
 0x84b   :  { %v1087_v26 = vpop.f32.mrf.mxu2 }
 0x84c   :  { %v1088_v58 = vadd.f32 %v3396_v45, %v1087_v26 }
 0x84e   :  { %v3500_v20 = vadd.f32 %v1088_v58, %v711_v0 }
 0x850   :  { %v1129_v29 = vmax.f32 %v3500_v20, 0.0 }
 0x852   :  { %2635 = vmatmul.msk.f32.gmra.mxu1 %vm101_vm0, %v1129_v29 }
 0x853   :  { %v1090_v59 = vpop.f32.mrf.mxu2 }
 0x854   :  { %v1091_v61 = vadd.f32 %v3396_v45, %v1090_v59 }
 0x856   :  { %v3509_v56 = vadd.f32 %v1091_v61, %v712_v4 }
 0x858   :  { %v4115_v32 = vmax.f32 %v3509_v56, 0.0 }
 0x85a   :  { %2636 = vmatmul.msk.f32.gmra.mxu1 %vm101_vm0, %v4115_v32 }
 0x85b   :  { %v1093_v62 = vpop.f32.mrf.mxu2 }
 0x85c   :  { %v1094_v0 = vadd.f32 %v3396_v45, %v1093_v62  ;;  %v3551_v62 = vld [vmem:[#allocation7 + $0x48] sm:$0xff] }
 0x85e   :  { %v3518_v35 = vadd.f32 %v1094_v0, %v713_v9  ;;  %v1339_v0 = vld [vmem:[#allocation2 + $0xd8] sm:$0xff] }
 0x85f   :  { %1400 = vmatpush.msrb.mxu0 %v1339_v0 }
 0x860   :  { %v4114_v51 = vmax.f32 %v3518_v35, 0.0 }
 0x862   :  { %2637 = vmatmul.msk.f32.gmra.mxu1 %vm101_vm0, %v4114_v51 }
 0x863   :  { %v1096_v3 = vpop.f32.mrf.mxu2 }
 0x864   :  { %v1097_v4 = vadd.f32 %v3396_v45, %v1096_v3  ;;  %v3555_v3 = vld [vmem:[#allocation7 + $0x58] sm:$0xff] }
 0x866   :  { %v3527_v60 = vadd.f32 %v1097_v4, %v714_v15  ;;  %v3558_v4 = vld [vmem:[#allocation7 + $0x60] sm:$0xff] }
 0x868   :  { %v4113_v63 = vmax.f32 %v3527_v60, 0.0 }
 0x86a   :  { %2638 = vmatmul.msk.f32.gmra.mxu1 %vm101_vm0, %v4113_v63 }
 0x86b   :  { %v1099_v7 = vpop.f32.mrf.mxu2 }
 0x86c   :  { %v1100_v9 = vadd.f32 %v3396_v45, %v1099_v7  ;;  %v1338_v7 = vld [vmem:[#allocation2 + $0xd0] sm:$0xff] }
 0x86d   :  { %1401 = vmatpush.msrb.mxu0 %v1338_v7 }
 0x86e   :  { %v3536_v2 = vadd.f32 %v1100_v9, %v715_v21  ;;  %v1337_v9 = vld [vmem:[#allocation2 + $0xc8] sm:$0xff] }
 0x86f   :  { %1402 = vmatpush.msrb.mxu0 %v1337_v9 }
 0x870   :  { %v4112_v5 = vmax.f32 %v3536_v2, 0.0 }
 0x872   :  { %2639 = vmatmul.msk.f32.gmra.mxu1 %vm101_vm0, %v4112_v5 }
 0x877   :  { %v1204_v13 = vpop.f32.mrf.mxu1 }
 0x87f   :  { %v1207_v15 = vpop.f32.mrf.mxu1 }
 0x887   :  { %v1210_v31 = vpop.f32.mrf.mxu1 }
 0x88f   :  { %v1213_v34 = vpop.f32.mrf.mxu1 }
 0x897   :  { %v1216_v49 = vpop.f32.mrf.mxu1 }
 0x89f   :  { %v1219_v57 = vpop.f32.mrf.mxu1 }
 0x8a7   :  { %v1222_v11 = vpop.f32.mrf.mxu1 }
 0x8af   :  { %v1225_v14 = vpop.f32.mrf.mxu1 }
 0x8b7   :  { %v1228_v23 = vpop.f32.mrf.mxu1 }
 0x8bf   :  { %v1231_v45 = vpop.f32.mrf.mxu1 }
 0x8c7   :  { %v1234_v26 = vpop.f32.mrf.mxu1 }
 0x8cf   :  { %v1237_v19 = vpop.f32.mrf.mxu1 }
 0x8d7   :  { %v1240_v21 = vpop.f32.mrf.mxu1 }
 0x8df   :  { %v1243_v58 = vpop.f32.mrf.mxu1 }
 0x8e7   :  { %v1246_v59 = vpop.f32.mrf.mxu1 }
 0x8ef   :  { %v1249_v61 = vpop.f32.mrf.mxu1 }
 0x8f0   :  { %1254 = vmatpush.msrb.mxu3 %v1249_v61 }
 0x8f2   :  { %1255 = vmatpush.msrb.mxu3 %v1246_v59 }
 0x8f4   :  { %1256 = vmatpush.msrb.mxu3 %v1243_v58 }
 0x8f6   :  { %1257 = vmatpush.msrb.mxu3 %v1240_v21 }
 0x8f8   :  { %1258 = vmatpush.msrb.mxu3 %v1237_v19 }
 0x8fa   :  { %1259 = vmatpush.msrb.mxu3 %v1234_v26 }
 0x8fc   :  { %1260 = vmatpush.msrb.mxu3 %v1231_v45 }
 0x8fe   :  { %1261 = vmatpush.msrb.mxu3 %v1228_v23 }
 0x900   :  { %1262 = vmatpush.msrb.mxu3 %v1225_v14 }
 0x902   :  { %1263 = vmatpush.msrb.mxu3 %v1222_v11 }
 0x904   :  { %1264 = vmatpush.msrb.mxu3 %v1219_v57 }
 0x906   :  { %1265 = vmatpush.msrb.mxu3 %v1216_v49  ;;  %v2746_v49 = vld [vmem:[#allocation7 + $0xf5] ss:$0 sm:$0xff] }
 0x908   :  { %1266 = vmatpush.msrb.mxu3 %v1213_v34  ;;  %v3567_v34 = vld [vmem:[#allocation7 + $0x78] sm:$0xff] }
 0x90a   :  { %1267 = vmatpush.msrb.mxu3 %v1210_v31  ;;  %v3564_v31 = vld [vmem:[#allocation7 + $0x70] sm:$0xff] }
 0x90c   :  { %1268 = vmatpush.msrb.mxu3 %v1207_v15  ;;  %v3561_v15 = vld [vmem:[#allocation7 + $0x68] sm:$0xff] }
 0x90e   :  { %1269 = vmatpush.msrb.mxu3 %v1204_v13  ;;  %v1336_v13 = vld [vmem:[#allocation2 + $0xc0] sm:$0xff] }
 0x90f   :  { %1270 = vmatmul.f32.vlgmr.msrb.gmra.mxu3 %v3360_v39  ;;  %1403 = vmatpush.msrb.mxu0 %v1336_v13 }
 0x917   :  { %1273 = vmatmul.f32.gmra.mxu3 %v3363_v8 }
 0x91f   :  { %1276 = vmatmul.f32.gmra.mxu3 %v3366_v10 }
 0x927   :  { %1279 = vmatmul.f32.gmra.mxu3 %v3369_v52 }
 0x92f   :  { %1282 = vmatmul.f32.gmra.mxu3 %v3372_v12 }
 0x937   :  { %1285 = vmatmul.f32.gmra.mxu3 %v3375_v33 }
 0x93f   :  { %1288 = vmatmul.f32.gmra.mxu3 %v3378_v16 }
 0x947   :  { %1291 = vmatmul.f32.gmra.mxu3 %v3381_v18 }
 0x94f   :  { %1294 = vmatmul.f32.gmra.mxu3 %v3384_v48 }
 0x957   :  { %1297 = vmatmul.f32.gmra.mxu3 %v3551_v62 }
 0x95f   :  { %1300 = vmatmul.f32.gmra.mxu3 %v3388_v37 }
 0x967   :  { %1303 = vmatmul.f32.gmra.mxu3 %v3555_v3 }
 0x96f   :  { %1306 = vmatmul.f32.gmra.mxu3 %v3558_v4 }
 0x977   :  { %1309 = vmatmul.f32.gmra.mxu3 %v3561_v15 }
 0x97f   :  { %1312 = vmatmul.f32.gmra.mxu3 %v3564_v31 }
 0x987   :  { %1315 = vmatmul.f32.gmra.mxu3 %v3567_v34 }
 0x992   :  { %v1271_v57 = vpop.f32.mrf.mxu3 }
 0x993   :  { %v1272_v11 = vadd.f32 %v2746_v49, %v1271_v57 }
 0x995   :  { %v1319_v14 = vmax.f32 %v1272_v11, 0.0 }
 0x997   :  { %2640 = vmatmul.msk.f32.vlgmr.msrb.gmra.mxu0 %vm101_vm0, %v1319_v14 }
 0x99a   :  { %v1274_v23 = vpop.f32.mrf.mxu3 }
 0x99b   :  { %v1275_v45 = vadd.f32 %v2746_v49, %v1274_v23 }
 0x99d   :  { %v1320_v26 = vmax.f32 %v1275_v45, 0.0 }
 0x99f   :  { %2641 = vmatmul.msk.f32.gmra.mxu0 %vm101_vm0, %v1320_v26 }
 0x9a2   :  { %v1277_v19 = vpop.f32.mrf.mxu3 }
 0x9a3   :  { %v1278_v21 = vadd.f32 %v2746_v49, %v1277_v19 }
 0x9a5   :  { %v1321_v58 = vmax.f32 %v1278_v21, 0.0 }
 0x9a7   :  { %2642 = vmatmul.msk.f32.gmra.mxu0 %vm101_vm0, %v1321_v58 }
 0x9aa   :  { %v1280_v59 = vpop.f32.mrf.mxu3 }
 0x9ab   :  { %v1281_v61 = vadd.f32 %v2746_v49, %v1280_v59 }
 0x9ad   :  { %v1322_v0 = vmax.f32 %v1281_v61, 0.0 }
 0x9af   :  { %2643 = vmatmul.msk.f32.gmra.mxu0 %vm101_vm0, %v1322_v0 }
 0x9b2   :  { %v1283_v7 = vpop.f32.mrf.mxu3 }
 0x9b3   :  { %v1284_v9 = vadd.f32 %v2746_v49, %v1283_v7 }
 0x9b5   :  { %v1323_v13 = vmax.f32 %v1284_v9, 0.0 }
 0x9b7   :  { %2644 = vmatmul.msk.f32.gmra.mxu0 %vm101_vm0, %v1323_v13 }
 0x9ba   :  { %v1286_v57 = vpop.f32.mrf.mxu3 }
 0x9bb   :  { %v1287_v11 = vadd.f32 %v2746_v49, %v1286_v57 }
 0x9bd   :  { %v1324_v14 = vmax.f32 %v1287_v11, 0.0 }
 0x9bf   :  { %2645 = vmatmul.msk.f32.gmra.mxu0 %vm101_vm0, %v1324_v14 }
 0x9c2   :  { %v1289_v23 = vpop.f32.mrf.mxu3 }
 0x9c3   :  { %v1290_v45 = vadd.f32 %v2746_v49, %v1289_v23 }
 0x9c5   :  { %v1325_v26 = vmax.f32 %v1290_v45, 0.0 }
 0x9c7   :  { %2646 = vmatmul.msk.f32.gmra.mxu0 %vm101_vm0, %v1325_v26 }
 0x9ca   :  { %v1292_v19 = vpop.f32.mrf.mxu3 }
 0x9cb   :  { %v1293_v21 = vadd.f32 %v2746_v49, %v1292_v19 }
 0x9cd   :  { %v1326_v58 = vmax.f32 %v1293_v21, 0.0 }
 0x9cf   :  { %2647 = vmatmul.msk.f32.gmra.mxu0 %vm101_vm0, %v1326_v58 }
 0x9d2   :  { %v1295_v59 = vpop.f32.mrf.mxu3 }
 0x9d3   :  { %v1296_v61 = vadd.f32 %v2746_v49, %v1295_v59 }
 0x9d5   :  { %v1327_v0 = vmax.f32 %v1296_v61, 0.0 }
 0x9d7   :  { %2648 = vmatmul.msk.f32.gmra.mxu0 %vm101_vm0, %v1327_v0 }
 0x9da   :  { %v1298_v7 = vpop.f32.mrf.mxu3 }
 0x9db   :  { %v1299_v9 = vadd.f32 %v2746_v49, %v1298_v7 }
 0x9dd   :  { %v1328_v13 = vmax.f32 %v1299_v9, 0.0 }
 0x9df   :  { %2649 = vmatmul.msk.f32.gmra.mxu0 %vm101_vm0, %v1328_v13 }
 0x9e2   :  { %v1301_v57 = vpop.f32.mrf.mxu3 }
 0x9e3   :  { %v1302_v11 = vadd.f32 %v2746_v49, %v1301_v57 }
 0x9e5   :  { %v1329_v14 = vmax.f32 %v1302_v11, 0.0 }
 0x9e7   :  { %2650 = vmatmul.msk.f32.gmra.mxu0 %vm101_vm0, %v1329_v14 }
 0x9ea   :  { %v1304_v23 = vpop.f32.mrf.mxu3 }
 0x9eb   :  { %v1305_v45 = vadd.f32 %v2746_v49, %v1304_v23 }
 0x9ed   :  { %v1330_v26 = vmax.f32 %v1305_v45, 0.0 }
 0x9ef   :  { %2651 = vmatmul.msk.f32.gmra.mxu0 %vm101_vm0, %v1330_v26 }
 0x9f2   :  { %v1307_v19 = vpop.f32.mrf.mxu3 }
 0x9f3   :  { %v1308_v21 = vadd.f32 %v2746_v49, %v1307_v19 }
 0x9f5   :  { %v1331_v58 = vmax.f32 %v1308_v21, 0.0 }
 0x9f7   :  { %2652 = vmatmul.msk.f32.gmra.mxu0 %vm101_vm0, %v1331_v58 }
 0x9fa   :  { %v1310_v59 = vpop.f32.mrf.mxu3 }
 0x9fb   :  { %v1311_v61 = vadd.f32 %v2746_v49, %v1310_v59 }
 0x9fd   :  { %v1332_v0 = vmax.f32 %v1311_v61, 0.0 }
 0x9ff   :  { %2653 = vmatmul.msk.f32.gmra.mxu0 %vm101_vm0, %v1332_v0 }
 0xa02   :  { %v1313_v7 = vpop.f32.mrf.mxu3 }
 0xa03   :  { %v1314_v9 = vadd.f32 %v2746_v49, %v1313_v7 }
 0xa05   :  { %v1333_v13 = vmax.f32 %v1314_v9, 0.0 }
 0xa07   :  { %2654 = vmatmul.msk.f32.gmra.mxu0 %vm101_vm0, %v1333_v13 }
 0xa0a   :  { %v1316_v57 = vpop.f32.mrf.mxu3 }
 0xa0b   :  { %v1317_v11 = vadd.f32 %v2746_v49, %v1316_v57 }
 0xa0d   :  { %v1334_v14 = vmax.f32 %v1317_v11, 0.0 }
 0xa0f   :  { %2655 = vmatmul.msk.f32.gmra.mxu0 %vm101_vm0, %v1334_v14 }
 0xa14   :  { %v1405_v23 = vpop.f32.mrf.mxu0 }
 0xa1c   :  { %v1408_v45 = vpop.f32.mrf.mxu0 }
 0xa24   :  { %v1411_v26 = vpop.f32.mrf.mxu0 }
 0xa2c   :  { %v1414_v19 = vpop.f32.mrf.mxu0 }
 0xa34   :  { %v1417_v21 = vpop.f32.mrf.mxu0 }
 0xa3c   :  { %v1420_v58 = vpop.f32.mrf.mxu0 }
 0xa44   :  { %v1423_v59 = vpop.f32.mrf.mxu0 }
 0xa4c   :  { %v1426_v61 = vpop.f32.mrf.mxu0 }
 0xa54   :  { %v1429_v5 = vpop.f32.mrf.mxu0 }
 0xa5c   :  { %v1432_v0 = vpop.f32.mrf.mxu0 }
 0xa64   :  { %v1435_v63 = vpop.f32.mrf.mxu0 }
 0xa6c   :  { %v1438_v7 = vpop.f32.mrf.mxu0 }
 0xa74   :  { %v1441_v9 = vpop.f32.mrf.mxu0 }
 0xa7c   :  { %v1444_v51 = vpop.f32.mrf.mxu0 }
 0xa84   :  { %v1447_v13 = vpop.f32.mrf.mxu0 }
 0xa8c   :  { %v1450_v32 = vpop.f32.mrf.mxu0 }
 0xa8d   :  { %1455 = vmatpush.msrb.mxu2 %v1450_v32  ;;  %v1564_v32 = vld [vmem:[#allocation5 + $0x60] sm:$0xff] }
 0xa8e   :  { %1692 = vmatpush.msra.mxu1 %v1564_v32 }
 0xa8f   :  { %1456 = vmatpush.msrb.mxu2 %v1447_v13 }
 0xa91   :  { %1457 = vmatpush.msrb.mxu2 %v1444_v51  ;;  %v1559_v51 = vld [vmem:[#allocation5 + $0x38] sm:$0xff] }
 0xa93   :  { %1458 = vmatpush.msrb.mxu2 %v1441_v9 }
 0xa95   :  { %1459 = vmatpush.msrb.mxu2 %v1438_v7 }
 0xa97   :  { %1460 = vmatpush.msrb.mxu2 %v1435_v63  ;;  %v1552_v63 = vld [vmem:[#allocation5] sm:$0xff] }
 0xa99   :  { %1461 = vmatpush.msrb.mxu2 %v1432_v0 }
 0xa9b   :  { %1462 = vmatpush.msrb.mxu2 %v1429_v5  ;;  %v1553_v5 = vld [vmem:[#allocation5 + $0x8] sm:$0xff] }
 0xa9d   :  { %1463 = vmatpush.msrb.mxu2 %v1426_v61 }
 0xa9f   :  { %1464 = vmatpush.msrb.mxu2 %v1423_v59 }
 0xaa1   :  { %1465 = vmatpush.msrb.mxu2 %v1420_v58 }
 0xaa3   :  { %1466 = vmatpush.msrb.mxu2 %v1417_v21 }
 0xaa5   :  { %1467 = vmatpush.msrb.mxu2 %v1414_v19 }
 0xaa7   :  { %1468 = vmatpush.msrb.mxu2 %v1411_v26 }
 0xaa9   :  { %1469 = vmatpush.msrb.mxu2 %v1408_v45 }
 0xaab   :  { %1470 = vmatpush.msrb.mxu2 %v1405_v23 }
 0xaac   :  { %1471 = vmatmul.f32.vlgmr.msrb.gmra.mxu2 %v3360_v39  ;;  %v1566_v39 = vld [vmem:[#allocation5 + $0x70] sm:$0xff] }
 0xaad   :  { %1822 = vmatpush.msra.mxu0 %v1566_v39 }
 0xab4   :  { %1474 = vmatmul.f32.gmra.mxu2 %v3363_v8  ;;  %v1565_v8 = vld [vmem:[#allocation5 + $0x68] sm:$0xff] }
 0xab5   :  { %1757 = vmatpush.msra.mxu3 %v1565_v8 }
 0xabc   :  { %1477 = vmatmul.f32.gmra.mxu2 %v3366_v10  ;;  %v1567_v10 = vld [vmem:[#allocation5 + $0x78] sm:$0xff] }
 0xabd   :  { %1887 = vmatpush.msra.mxu2 %v1567_v10 }
 0xac4   :  { %1480 = vmatmul.f32.gmra.mxu2 %v3369_v52  ;;  %v1560_v52 = vld [vmem:[#allocation5 + $0x40] sm:$0xff] }
 0xac5   :  { %1693 = vmatpush.msra.mxu1 %v1560_v52 }
 0xacc   :  { %1483 = vmatmul.f32.gmra.mxu2 %v3372_v12  ;;  %v1561_v12 = vld [vmem:[#allocation5 + $0x48] sm:$0xff] }
 0xacd   :  { %1758 = vmatpush.msra.mxu3 %v1561_v12 }
 0xad4   :  { %1486 = vmatmul.f32.gmra.mxu2 %v3375_v33  ;;  %v1562_v33 = vld [vmem:[#allocation5 + $0x50] sm:$0xff] }
 0xad5   :  { %1823 = vmatpush.msra.mxu0 %v1562_v33 }
 0xadc   :  { %1489 = vmatmul.f32.gmra.mxu2 %v3378_v16  ;;  %v1563_v16 = vld [vmem:[#allocation5 + $0x58] sm:$0xff] }
 0xadd   :  { %1888 = vmatpush.msra.mxu2 %v1563_v16 }
 0xadf   :  { %1889 = vmatpush.msra.mxu2 %v1559_v51 }
 0xae4   :  { %1492 = vmatmul.f32.gmra.mxu2 %v3381_v18  ;;  %v1556_v18 = vld [vmem:[#allocation5 + $0x20] sm:$0xff] }
 0xae5   :  { %1694 = vmatpush.msra.mxu1 %v1556_v18 }
 0xae7   :  { %1695 = vmatpush.msra.mxu1 %v1552_v63  ;;  %v4129_v63 = vmax.f32 %v3518_v35, 0.0 }
 0xaec   :  { %1495 = vmatmul.f32.gmra.mxu2 %v3384_v48  ;;  %v1557_v48 = vld [vmem:[#allocation5 + $0x28] sm:$0xff] }
 0xaed   :  { %1759 = vmatpush.msra.mxu3 %v1557_v48  ;;  %v4128_v48 = vmax.f32 %v3509_v56, 0.0 }
 0xaef   :  { %1760 = vmatpush.msra.mxu3 %v1553_v5 }
 0xaf4   :  { %1498 = vmatmul.f32.gmra.mxu2 %v3551_v62  ;;  %v1554_v62 = vld [vmem:[#allocation5 + $0x10] sm:$0xff] }
 0xafc   :  { %1501 = vmatmul.f32.gmra.mxu2 %v3388_v37  ;;  %v1558_v37 = vld [vmem:[#allocation5 + $0x30] sm:$0xff] }
 0xafd   :  { %1824 = vmatpush.msra.mxu0 %v1558_v37 }
 0xaff   :  { %1825 = vmatpush.msra.mxu0 %v1554_v62 }
 0xb04   :  { %1504 = vmatmul.f32.gmra.mxu2 %v3555_v3  ;;  %v1555_v3 = vld [vmem:[#allocation5 + $0x18] sm:$0xff] }
 0xb05   :  { %1890 = vmatpush.msra.mxu2 %v1555_v3 }
 0xb0c   :  { %1507 = vmatmul.f32.gmra.mxu2 %v3558_v4  ;;  %v3602_v4 = vld [vmem:[#allocation7 + $0xf6] ss:$0 sm:$0xff] }
 0xb14   :  { %1510 = vmatmul.f32.gmra.mxu2 %v3561_v15 }
 0xb1c   :  { %1513 = vmatmul.f32.gmra.mxu2 %v3564_v31 }
 0xb24   :  { %1516 = vmatmul.f32.gmra.mxu2 %v3567_v34 }
 0xb2f   :  { %v1472_v49 = vpop.f32.mrf.mxu2 }
 0xb30   :  { %v1473_v57 = vadd.f32 %v3602_v4, %v1472_v49  ;;  %v4130_v49 = vmax.f32 %v3527_v60, 0.0  ;;  %v1568_v60 = vld [vmem:[#allocation5 + $0x80] sm:$0xff] }
 0xb32   :  { %v1520_v15 = vadd.f32 %v1473_v57, %v1118_v50 }
 0xb34   :  { %v1536_v11 = vmax.f32 %v1520_v15, 0.0 }
 0xb36   :  { %2656 = vmatmul.msk.f32.vlgmr.msra.gmra.mxu1 %vm101_vm0, %v1536_v11  ;;  %2672 = vmatmul.msk.f32.vlgmr.msra.gmra.mxu3 %vm101_vm0, %v1536_v11 }
 0xb37   :  { %2688 = vmatmul.msk.f32.vlgmr.msra.gmra.mxu0 %vm101_vm0, %v1536_v11  ;;  %2704 = vmatmul.msk.f32.vlgmr.msra.gmra.mxu2 %vm101_vm0, %v1536_v11  ;;  %v1475_v31 = vpop.f32.mrf.mxu2 }
 0xb38   :  { %v1476_v34 = vadd.f32 %v3602_v4, %v1475_v31  ;;  %v4131_v31 = vmax.f32 %v3536_v2, 0.0 }
 0xb3a   :  { %v1521_v14 = vadd.f32 %v1476_v34, %v1119_v44 }
 0xb3c   :  { %v1537_v23 = vmax.f32 %v1521_v14, 0.0 }
 0xb3e   :  { %2657 = vmatmul.msk.f32.gmra.mxu1 %vm101_vm0, %v1537_v23  ;;  %2673 = vmatmul.msk.f32.gmra.mxu3 %vm101_vm0, %v1537_v23 }
 0xb3f   :  { %2689 = vmatmul.msk.f32.gmra.mxu0 %vm101_vm0, %v1537_v23  ;;  %2705 = vmatmul.msk.f32.gmra.mxu2 %vm101_vm0, %v1537_v23  ;;  %v1478_v47 = vpop.f32.mrf.mxu2 }
 0xb40   :  { %v1479_v50 = vadd.f32 %v3602_v4, %v1478_v47 }
 0xb42   :  { %v1522_v45 = vadd.f32 %v1479_v50, %v1120_v22 }
 0xb44   :  { %v1538_v26 = vmax.f32 %v1522_v45, 0.0 }
 0xb46   :  { %2658 = vmatmul.msk.f32.gmra.mxu1 %vm101_vm0, %v1538_v26  ;;  %2674 = vmatmul.msk.f32.gmra.mxu3 %vm101_vm0, %v1538_v26 }
 0xb47   :  { %2690 = vmatmul.msk.f32.gmra.mxu0 %vm101_vm0, %v1538_v26  ;;  %2706 = vmatmul.msk.f32.gmra.mxu2 %vm101_vm0, %v1538_v26  ;;  %v1481_v55 = vpop.f32.mrf.mxu2 }
 0xb48   :  { %v1482_v44 = vadd.f32 %v3602_v4, %v1481_v55 }
 0xb4a   :  { %v1523_v19 = vadd.f32 %v1482_v44, %v1121_v25 }
 0xb4c   :  { %v1539_v21 = vmax.f32 %v1523_v19, 0.0 }
 0xb4e   :  { %2659 = vmatmul.msk.f32.gmra.mxu1 %vm101_vm0, %v1539_v21  ;;  %2675 = vmatmul.msk.f32.gmra.mxu3 %vm101_vm0, %v1539_v21 }
 0xb4f   :  { %2691 = vmatmul.msk.f32.gmra.mxu0 %vm101_vm0, %v1539_v21  ;;  %2707 = vmatmul.msk.f32.gmra.mxu2 %vm101_vm0, %v1539_v21  ;;  %v1484_v46 = vpop.f32.mrf.mxu2  ;;  %v1576_v21 = vld [vmem:[#allocation5 + $0xc0] sm:$0xff] }
 0xb50   :  { %v1485_v22 = vadd.f32 %v3602_v4, %v1484_v46 }
 0xb52   :  { %v1524_v58 = vadd.f32 %v1485_v22, %v1122_v27 }
 0xb54   :  { %v1540_v59 = vmax.f32 %v1524_v58, 0.0 }
 0xb56   :  { %2660 = vmatmul.msk.f32.gmra.mxu1 %vm101_vm0, %v1540_v59  ;;  %2676 = vmatmul.msk.f32.gmra.mxu3 %vm101_vm0, %v1540_v59 }
 0xb57   :  { %2692 = vmatmul.msk.f32.gmra.mxu0 %vm101_vm0, %v1540_v59  ;;  %2708 = vmatmul.msk.f32.gmra.mxu2 %vm101_vm0, %v1540_v59  ;;  %v1487_v24 = vpop.f32.mrf.mxu2 }
 0xb58   :  { %v1488_v25 = vadd.f32 %v3602_v4, %v1487_v24 }
 0xb5a   :  { %v1525_v61 = vadd.f32 %v1488_v25, %v1123_v6  ;;  %v1580_v25 = vld [vmem:[#allocation5 + $0xe0] sm:$0xff] }
 0xb5c   :  { %v1541_v0 = vmax.f32 %v1525_v61, 0.0 }
 0xb5e   :  { %2661 = vmatmul.msk.f32.gmra.mxu1 %vm101_vm0, %v1541_v0  ;;  %2677 = vmatmul.msk.f32.gmra.mxu3 %vm101_vm0, %v1541_v0 }
 0xb5f   :  { %2693 = vmatmul.msk.f32.gmra.mxu0 %vm101_vm0, %v1541_v0  ;;  %2709 = vmatmul.msk.f32.gmra.mxu2 %vm101_vm0, %v1541_v0  ;;  %v1490_v1 = vpop.f32.mrf.mxu2 }
 0xb60   :  { %v1491_v27 = vadd.f32 %v3602_v4, %v1490_v1 }
 0xb62   :  { %v1526_v7 = vadd.f32 %v1491_v27, %v1124_v36 }
 0xb64   :  { %v1542_v9 = vmax.f32 %v1526_v7, 0.0  ;;  %v1581_v7 = vld [vmem:[#allocation5 + $0xe8] sm:$0xff] }
 0xb66   :  { %2662 = vmatmul.msk.f32.gmra.mxu1 %vm101_vm0, %v1542_v9  ;;  %2678 = vmatmul.msk.f32.gmra.mxu3 %vm101_vm0, %v1542_v9 }
 0xb67   :  { %2694 = vmatmul.msk.f32.gmra.mxu0 %vm101_vm0, %v1542_v9  ;;  %2710 = vmatmul.msk.f32.gmra.mxu2 %vm101_vm0, %v1542_v9  ;;  %v1493_v28 = vpop.f32.mrf.mxu2 }
 0xb68   :  { %v1494_v6 = vadd.f32 %v3602_v4, %v1493_v28  ;;  %v1584_v28 = vld [vmem:[#allocation5 + $0x100] sm:$0xff] }
 0xb6a   :  { %v1527_v13 = vadd.f32 %v1494_v6, %v1125_v40 }
 0xb6c   :  { %v1543_v32 = vmax.f32 %v1527_v13, 0.0 }
 0xb6e   :  { %2663 = vmatmul.msk.f32.gmra.mxu1 %vm101_vm0, %v1543_v32  ;;  %2679 = vmatmul.msk.f32.gmra.mxu3 %vm101_vm0, %v1543_v32 }
 0xb6f   :  { %2695 = vmatmul.msk.f32.gmra.mxu0 %vm101_vm0, %v1543_v32  ;;  %2711 = vmatmul.msk.f32.gmra.mxu2 %vm101_vm0, %v1543_v32  ;;  %v1496_v30 = vpop.f32.mrf.mxu2 }
 0xb70   :  { %v1497_v36 = vadd.f32 %v3602_v4, %v1496_v30 }
 0xb72   :  { %v1528_v39 = vadd.f32 %v1497_v36, %v1126_v42 }
 0xb74   :  { %v1544_v8 = vmax.f32 %v1528_v39, 0.0  ;;  %v1585_v39 = vld [vmem:[#allocation5 + $0x108] sm:$0xff] }
 0xb76   :  { %2664 = vmatmul.msk.f32.gmra.mxu1 %vm101_vm0, %v1544_v8  ;;  %2680 = vmatmul.msk.f32.gmra.mxu3 %vm101_vm0, %v1544_v8 }
 0xb77   :  { %2696 = vmatmul.msk.f32.gmra.mxu0 %vm101_vm0, %v1544_v8  ;;  %2712 = vmatmul.msk.f32.gmra.mxu2 %vm101_vm0, %v1544_v8  ;;  %v1499_v38 = vpop.f32.mrf.mxu2 }
 0xb78   :  { %v1500_v40 = vadd.f32 %v3602_v4, %v1499_v38  ;;  %v1588_v38 = vld [vmem:[#allocation5 + $0x120] sm:$0xff] }
 0xb7a   :  { %v1529_v10 = vadd.f32 %v1500_v40, %v1127_v53 }
 0xb7c   :  { %v1545_v52 = vmax.f32 %v1529_v10, 0.0 }
 0xb7e   :  { %2665 = vmatmul.msk.f32.gmra.mxu1 %vm101_vm0, %v1545_v52  ;;  %2681 = vmatmul.msk.f32.gmra.mxu3 %vm101_vm0, %v1545_v52 }
 0xb7f   :  { %2697 = vmatmul.msk.f32.gmra.mxu0 %vm101_vm0, %v1545_v52  ;;  %2713 = vmatmul.msk.f32.gmra.mxu2 %vm101_vm0, %v1545_v52  ;;  %v1502_v41 = vpop.f32.mrf.mxu2 }
 0xb80   :  { %v1503_v42 = vadd.f32 %v3602_v4, %v1502_v41 }
 0xb82   :  { %v1530_v12 = vadd.f32 %v1503_v42, %v1128_v17 }
 0xb84   :  { %v1546_v33 = vmax.f32 %v1530_v12, 0.0  ;;  %v1590_v12 = vld [vmem:[#allocation5 + $0x130] sm:$0xff] }
 0xb86   :  { %2666 = vmatmul.msk.f32.gmra.mxu1 %vm101_vm0, %v1546_v33  ;;  %2682 = vmatmul.msk.f32.gmra.mxu3 %vm101_vm0, %v1546_v33 }
 0xb87   :  { %2698 = vmatmul.msk.f32.gmra.mxu0 %vm101_vm0, %v1546_v33  ;;  %2714 = vmatmul.msk.f32.gmra.mxu2 %vm101_vm0, %v1546_v33  ;;  %v1505_v43 = vpop.f32.mrf.mxu2 }
 0xb88   :  { %v1506_v53 = vadd.f32 %v3602_v4, %v1505_v43  ;;  %v1592_v43 = vld [vmem:[#allocation5 + $0x140] sm:$0xff] }
 0xb8a   :  { %v1531_v16 = vadd.f32 %v1506_v53, %v1129_v29 }
 0xb8c   :  { %v1547_v18 = vmax.f32 %v1531_v16, 0.0 }
 0xb8e   :  { %2667 = vmatmul.msk.f32.gmra.mxu1 %vm101_vm0, %v1547_v18  ;;  %2683 = vmatmul.msk.f32.gmra.mxu3 %vm101_vm0, %v1547_v18 }
 0xb8f   :  { %2699 = vmatmul.msk.f32.gmra.mxu0 %vm101_vm0, %v1547_v18  ;;  %2715 = vmatmul.msk.f32.gmra.mxu2 %vm101_vm0, %v1547_v18  ;;  %v1508_v54 = vpop.f32.mrf.mxu2 }
 0xb90   :  { %v1509_v17 = vadd.f32 %v3602_v4, %v1508_v54 }
 0xb92   :  { %v1532_v37 = vadd.f32 %v1509_v17, %v4128_v48  ;;  %v1589_v48 = vld [vmem:[#allocation5 + $0x128] sm:$0xff] }
 0xb94   :  { %v1548_v51 = vmax.f32 %v1532_v37, 0.0  ;;  %v1594_v37 = vld [vmem:[#allocation5 + $0x150] sm:$0xff] }
 0xb96   :  { %2668 = vmatmul.msk.f32.gmra.mxu1 %vm101_vm0, %v1548_v51  ;;  %2684 = vmatmul.msk.f32.gmra.mxu3 %vm101_vm0, %v1548_v51 }
 0xb97   :  { %2700 = vmatmul.msk.f32.gmra.mxu0 %vm101_vm0, %v1548_v51  ;;  %2716 = vmatmul.msk.f32.gmra.mxu2 %vm101_vm0, %v1548_v51  ;;  %v1511_v20 = vpop.f32.mrf.mxu2 }
 0xb98   :  { %v1512_v29 = vadd.f32 %v3602_v4, %v1511_v20  ;;  %v1596_v20 = vld [vmem:[#allocation5 + $0x160] sm:$0xff] }
 0xb9a   :  { %v1533_v5 = vadd.f32 %v1512_v29, %v4129_v63 }
 0xb9c   :  { %v1549_v62 = vmax.f32 %v1533_v5, 0.0 }
 0xb9e   :  { %2669 = vmatmul.msk.f32.gmra.mxu1 %vm101_vm0, %v1549_v62  ;;  %2685 = vmatmul.msk.f32.gmra.mxu3 %vm101_vm0, %v1549_v62 }
 0xb9f   :  { %2701 = vmatmul.msk.f32.gmra.mxu0 %vm101_vm0, %v1549_v62  ;;  %2717 = vmatmul.msk.f32.gmra.mxu2 %vm101_vm0, %v1549_v62  ;;  %v1514_v56 = vpop.f32.mrf.mxu2 }
 0xba0   :  { %v1515_v3 = vadd.f32 %v3602_v4, %v1514_v56 }
 0xba2   :  { %v1534_v57 = vadd.f32 %v1515_v3, %v4130_v49  ;;  %v1593_v49 = vld [vmem:[#allocation5 + $0x148] sm:$0xff] }
 0xba4   :  { %v1550_v15 = vmax.f32 %v1534_v57, 0.0 }
 0xba6   :  { %2670 = vmatmul.msk.f32.gmra.mxu1 %vm101_vm0, %v1550_v15  ;;  %2686 = vmatmul.msk.f32.gmra.mxu3 %vm101_vm0, %v1550_v15 }
 0xba7   :  { %2702 = vmatmul.msk.f32.gmra.mxu0 %vm101_vm0, %v1550_v15  ;;  %2718 = vmatmul.msk.f32.gmra.mxu2 %vm101_vm0, %v1550_v15  ;;  %v1517_v35 = vpop.f32.mrf.mxu2  ;;  %v1600_v15 = vld [vmem:[#allocation5 + $0x180] sm:$0xff] }
 0xba8   :  { %v1518_v11 = vadd.f32 %v3602_v4, %v1517_v35  ;;  %v1572_v4 = vld [vmem:[#allocation5 + $0xa0] sm:$0xff]  ;;  %v1598_v35 = vld [vmem:[#allocation5 + $0x170] sm:$0xff] }
 0xbaa   :  { %v1535_v34 = vadd.f32 %v1518_v11, %v4131_v31 }
 0xbac   :  { %v1551_v14 = vmax.f32 %v1535_v34, 0.0 }
 0xbae   :  { %2671 = vmatmul.msk.f32.gmra.mxu1 %vm101_vm0, %v1551_v14  ;;  %2687 = vmatmul.msk.f32.gmra.mxu3 %vm101_vm0, %v1551_v14 }
 0xbaf   :  { %2703 = vmatmul.msk.f32.gmra.mxu0 %vm101_vm0, %v1551_v14  ;;  %2719 = vmatmul.msk.f32.gmra.mxu2 %vm101_vm0, %v1551_v14 }
 0xbb3   :  { %v1697_v23 = vpop.f32.mrf.mxu1 }
 0xbb4   :  { %v3716_v47 = vmul.f32 %v1697_v23, %v1568_v60  ;;  %v3718_v50 = vpop.f32.mrf.mxu0 }
 0xbb6   :  { %2020 = vrot.lane.b32.xlu0 %v3716_v47, %s2884_s0 }
 0xbb9   :  { %v3722_v2 = vpop.f32.mrf.mxu3 }
 0xbba   :  { %v3724_v45 = vpop.f32.mrf.mxu2 }
 0xbbb   :  { %v1700_v26 = vpop.f32.mrf.mxu1 }
 0xbbc   :  { %v3726_v55 = vmul.f32 %v1700_v26, %v1572_v4  ;;  %v3728_v44 = vpop.f32.mrf.mxu0  ;;  %v1602_v4 = vld [vmem:[#allocation5 + $0x190] sm:$0xff]  ;;  %v1604_v26 = vld [vmem:[#allocation5 + $0x1a0] sm:$0xff] }
 0xbbe   :  { %4132 = vst [vmem:[#allocation12_spill] sm:$0xff] %v3726_v55  ;;  %2022 = vrot.lane.b32.xlu2 %v3726_v55, %s2884_s0 }
 0xbc1   :  { %v3732_v19 = vpop.f32.mrf.mxu3 }
 0xbc2   :  { %v3734_v46 = vpop.f32.mrf.mxu2 }
 0xbc3   :  { %v1703_v22 = vpop.f32.mrf.mxu1 }
 0xbc4   :  { %v3736_v58 = vmul.f32 %v1703_v22, %v1576_v21  ;;  %v3738_v59 = vpop.f32.mrf.mxu0  ;;  %v1597_v21 = vld [vmem:[#allocation5 + $0x168] sm:$0xff] }
 0xbc6   :  { %2024 = vrot.lane.b32.xlu1 %v3736_v58, %s2884_s0 }
 0xbc9   :  { %v3742_v24 = vpop.f32.mrf.mxu3 }
 0xbca   :  { %v3744_v61 = vpop.f32.mrf.mxu2 }
 0xbcb   :  { %v1706_v0 = vpop.f32.mrf.mxu1 }
 0xbcc   :  { %v3746_v1 = vmul.f32 %v1706_v0, %v1580_v25  ;;  %v3748_v27 = vpop.f32.mrf.mxu0 }
 0xbce   :  { %2026 = vrot.lane.b32.xlu0 %v3746_v1, %s2884_s0 }
 0xbd1   :  { %v1771_v9 = vpop.f32.mrf.mxu3 }
 0xbd2   :  { %v3752_v6 = vpop.f32.mrf.mxu2  ;;  %v3754_v32 = vmul.f32 %v1771_v9, %v1581_v7 }
 0xbd3   :  { %v1709_v13 = vpop.f32.mrf.mxu1 }
 0xbd4   :  { %v3756_v30 = vmul.f32 %v1709_v13, %v1584_v28  ;;  %v3758_v36 = vpop.f32.mrf.mxu0 }
 0xbd6   :  { %2122 = vrot.lane.b32.xlu0 %v3754_v32, %s2884_s0  ;;  %2028 = vrot.lane.b32.xlu2 %v3756_v30, %s2884_s0 }
 0xbd9   :  { %v1774_v8 = vpop.f32.mrf.mxu3 }
 0xbda   :  { %v3764_v40 = vpop.f32.mrf.mxu2  ;;  %v3766_v52 = vmul.f32 %v1774_v8, %v1585_v39  ;;  %v1601_v39 = vld [vmem:[#allocation5 + $0x188] sm:$0xff]  ;;  %v1606_v8 = vld [vmem:[#allocation5 + $0x1b0] sm:$0xff] }
 0xbdb   :  { %v1712_v10 = vpop.f32.mrf.mxu1 }
 0xbdc   :  { %v3768_v41 = vmul.f32 %v1712_v10, %v1588_v38  ;;  %v1842_v42 = vpop.f32.mrf.mxu0  ;;  %v1599_v38 = vld [vmem:[#allocation5 + $0x178] sm:$0xff] }
 0xbdd   :  { %v3776_v18 = vmul.f32 %v1842_v42, %v1590_v12 }
 0xbde   :  { %2124 = vrot.lane.b32.xlu2 %v3766_v52, %s2884_s0  ;;  %2030 = vrot.lane.b32.xlu1 %v3768_v41, %s2884_s0 }
 0xbe1   :  { %v1777_v33 = vpop.f32.mrf.mxu3 }
 0xbe2   :  { %v3774_v53 = vpop.f32.mrf.mxu2  ;;  %v3784_v63 = vmul.f32 %v1777_v33, %v1589_v48 }
 0xbe3   :  { %v1715_v16 = vpop.f32.mrf.mxu1 }
 0xbe4   :  { %v3778_v54 = vmul.f32 %v1715_v16, %v1592_v43  ;;  %v1845_v17 = vpop.f32.mrf.mxu0  ;;  %v1603_v16 = vld [vmem:[#allocation5 + $0x198] sm:$0xff] }
 0xbe5   :  { %v3786_v5 = vmul.f32 %v1845_v17, %v1594_v37  ;;  %v1605_v17 = vld [vmem:[#allocation5 + $0x1a8] sm:$0xff]  ;;  %v1610_v37 = vld [vmem:[#allocation5 + $0x1d0] sm:$0xff] }
 0xbe6   :  { %2222 = vrot.lane.b32.xlu1 %v3776_v18, %s2884_s0  ;;  %2032 = vrot.lane.b32.xlu0 %v3778_v54, %s2884_s0 }
 0xbe9   :  { %v1780_v51 = vpop.f32.mrf.mxu3 }
 0xbea   :  { %v3788_v62 = vpop.f32.mrf.mxu2  ;;  %v3798_v31 = vmul.f32 %v1780_v51, %v1593_v49 }
 0xbeb   :  { %v1718_v29 = vpop.f32.mrf.mxu1 }
 0xbec   :  { %v3790_v56 = vmul.f32 %v1718_v29, %v1596_v20  ;;  %v1848_v3 = vpop.f32.mrf.mxu0 }
 0xbed   :  { %v3802_v60 = vmul.f32 %v1848_v3, %v1598_v35 }
 0xbee   :  { %2126 = vrot.lane.b32.xlu1 %v3784_v63, %s2884_s0  ;;  %2224 = vrot.lane.b32.xlu0 %v3786_v5, %s2884_s0 }
 0xbef   :  { %2034 = vrot.lane.b32.xlu2 %v3790_v56, %s2884_s0 }
 0xbf1   :  { %v1783_v57 = vpop.f32.mrf.mxu3 }
 0xbf2   :  { %v1913_v23 = vpop.f32.mrf.mxu2  ;;  %v3814_v9 = vmul.f32 %v1783_v57, %v1597_v21  ;;  %v1607_v57 = vld [vmem:[#allocation5 + $0x1b8] sm:$0xff] }
 0xbf3   :  { %v1721_v11 = vpop.f32.mrf.mxu1  ;;  %v3826_v12 = vmul.f32 %v1913_v23, %v1599_v38 }
 0xbf4   :  { %v3800_v34 = vmul.f32 %v1721_v11, %v1600_v15  ;;  %v1851_v14 = vpop.f32.mrf.mxu0  ;;  %v1614_v15 = vld [vmem:[#allocation5 + $0x1f0] sm:$0xff]  ;;  %v1609_v11 = vld [vmem:[#allocation5 + $0x1c8] sm:$0xff] }
 0xbf5   :  { %v3810_v0 = vmul.f32 %v1851_v14, %v1602_v4 }
 0xbf6   :  { %2128 = vrot.lane.b32.xlu0 %v3798_v31, %s2884_s0  ;;  %2036 = vrot.lane.b32.xlu1 %v3800_v34, %s2884_s0 }
 0xbf7   :  { %2226 = vrot.lane.b32.xlu2 %v3802_v60, %s2884_s0 }
 0xbf9   :  { %v1786_v22 = vpop.f32.mrf.mxu3 }
 0xbfa   :  { %v1916_v13 = vpop.f32.mrf.mxu2  ;;  %v3822_v10 = vmul.f32 %v1786_v22, %v1601_v39  ;;  %v1608_v22 = vld [vmem:[#allocation5 + $0x1c0] sm:$0xff] }
 0xbfb   :  { %v1724_v25 = vpop.f32.mrf.mxu1  ;;  %v3834_v51 = vmul.f32 %v1916_v13, %v1603_v16  ;;  %v1611_v13 = vld [vmem:[#allocation5 + $0x1d8] sm:$0xff]  ;;  %v1612_v16 = vld [vmem:[#allocation5 + $0x1e0] sm:$0xff] }
 0xbfc   :  { %v3812_v7 = vmul.f32 %v1724_v25, %v1604_v26  ;;  %v1854_v28 = vpop.f32.mrf.mxu0  ;;  %v1613_v25 = vld [vmem:[#allocation5 + $0x1e8] sm:$0xff] }
 0xbfd   :  { %v3824_v42 = vmul.f32 %v1854_v28, %v1606_v8 }
 0xbfe   :  { %2228 = vrot.lane.b32.xlu1 %v3810_v0, %s2884_s0  ;;  %2038 = vrot.lane.b32.xlu0 %v3812_v7, %s2884_s0 }
 0xbff   :  { %2130 = vrot.lane.b32.xlu2 %v3814_v9, %s2884_s0 }
 0xc01   :  { %v1789_v33 = vpop.f32.mrf.mxu3 }
 0xc02   :  { %v1919_v48 = vpop.f32.mrf.mxu2  ;;  %v3836_v20 = vmul.f32 %v1789_v33, %v1605_v17  ;;  %v1615_v17 = vld [vmem:[#allocation5 + $0x1f8] sm:$0xff] }
 0xc03   :  { %v1727_v3 = vpop.f32.mrf.mxu1  ;;  %v3846_v14 = vmul.f32 %v1919_v48, %v1607_v57  ;;  %v1616_v48 = vld [vmem:[#allocation5 + $0x200] sm:$0xff] }
 0xc04   :  { %v1857_v43 = vpop.f32.mrf.mxu0  ;;  %v3858_v39 = vmul.f32 %v1727_v3, %v1608_v22  ;;  %v1618_v22 = vld [vmem:[#allocation5 + $0x210] sm:$0xff] }
 0xc05   :  { %v3838_v29 = vmul.f32 %v1857_v43, %v1610_v37 }
 0xc06   :  { %2132 = vrot.lane.b32.xlu1 %v3822_v10, %s2884_s0  ;;  %2230 = vrot.lane.b32.xlu0 %v3824_v42, %s2884_s0 }
 0xc07   :  { %2322 = vrot.lane.b32.xlu2 %v3826_v12, %s2884_s0 }
 0xc09   :  { %v1792_v49 = vpop.f32.mrf.mxu3 }
 0xc0a   :  { %v1922_v23 = vpop.f32.mrf.mxu2  ;;  %v3850_v26 = vmul.f32 %v1792_v49, %v1609_v11 }
 0xc0b   :  { %v1730_v21 = vpop.f32.mrf.mxu1  ;;  %v3862_v38 = vmul.f32 %v1922_v23, %v1611_v13 }
 0xc0c   :  { %v1860_v35 = vpop.f32.mrf.mxu0  ;;  %v3870_v3 = vmul.f32 %v1730_v21, %v1612_v16 }
 0xc0d   :  { %v3848_v4 = vmul.f32 %v1860_v35, %v1614_v15  ;;  %v1569_v15 = vld [vmem:[#allocation5 + $0x88] sm:$0xff] }
 0xc0e   :  { %2324 = vrot.lane.b32.xlu1 %v3834_v51, %s2884_s0  ;;  %2134 = vrot.lane.b32.xlu0 %v3836_v20, %s2884_s0  ;;  %v3885_v21 = vmul.f32 %v3722_v2, %v1569_v15  ;;  %v1619_v2 = vld [vmem:[#allocation5 + $0x218] sm:$0xff]  ;;  %v1620_v15 = vld [vmem:[#allocation5 + $0x220] sm:$0xff] }
 0xc0f   :  { %2232 = vrot.lane.b32.xlu2 %v3838_v29, %s2884_s0  ;;  %4133 = vst [vmem:[#allocation13_spill] sm:$0xff] %v3848_v4 }
 0xc11   :  { %v1795_v28 = vpop.f32.mrf.mxu3 }
 0xc12   :  { %v3860_v8 = vmul.f32 %v1795_v28, %v1613_v25  ;;  %v1925_v33 = vpop.f32.mrf.mxu2  ;;  %v1617_v25 = vld [vmem:[#allocation5 + $0x208] sm:$0xff] }
 0xc13   :  { %v1733_v37 = vpop.f32.mrf.mxu1  ;;  %v3872_v49 = vmul.f32 %v1925_v33, %v1615_v17  ;;  %v1622_v33 = vld [vmem:[#allocation5 + $0x230] sm:$0xff] }
 0xc14   :  { %v1863_v43 = vpop.f32.mrf.mxu0  ;;  %v3874_v57 = vmul.f32 %v1733_v37, %v1616_v48 }
 0xc15   :  { %4134 = vst [vmem:[#allocation14_spill] sm:$0xff] %v3872_v49  ;;  %v3891_v48 = vmul.f32 %v1863_v43, %v1618_v22 }
 0xc16   :  { %2234 = vrot.lane.b32.xlu1 %v3848_v4, %s2884_s0  ;;  %2326 = vrot.lane.b32.xlu0 %v3846_v14, %s2884_s0  ;;  %v1626_v4 = vld [vmem:[#allocation5 + $0x250] sm:$0xff] }
 0xc17   :  { %2136 = vrot.lane.b32.xlu2 %v3850_v26, %s2884_s0  ;;  %4137 = vst [vmem:[#allocation17_spill] sm:$0xff] %v3891_v48 }
 0xc18   :  { %v3880_v35 = vpop.permute.xlu2 %2022 }
 0xc19   :  { %4135 = vst [vmem:[#allocation15_spill] sm:$0xff] %v3880_v35  ;;  %v1798_v28 = vpop.f32.mrf.mxu3 }
 0xc1a   :  { %v1928_v11 = vpop.f32.mrf.mxu2  ;;  %v3893_v37 = vmul.f32 %v1798_v28, %v1617_v25 }
 0xc1b   :  { %v1736_v35 = vpop.f32.mrf.mxu1  ;;  %v3904_v25 = vmul.f32 %v1928_v11, %v1619_v2 }
 0xc1c   :  { %v1866_v16 = vpop.f32.mrf.mxu0  ;;  %4138 = vst [vmem:[#allocation18_spill] sm:$0xff] %v3893_v37  ;;  %v3906_v28 = vmul.f32 %v1736_v35, %v1620_v15  ;;  %v1621_v15 = vld [vmem:[#allocation5 + $0x228] sm:$0xff] }
 0xc1d   :  { %v3895_v55 = vmul.f32 %v1866_v16, %v1622_v33  ;;  %4140 = vst [vmem:[#allocation20_spill] sm:$0xff] %v3904_v25  ;;  %v1577_v16 = vld [vmem:[#allocation5 + $0xc8] sm:$0xff] }
 0xc1e   :  { %2138 = vrot.lane.b32.xlu1 %v3860_v8, %s2884_s0  ;;  %2040 = vrot.lane.b32.xlu0 %v3858_v39, %s2884_s0 }
 0xc1f   :  { %2328 = vrot.lane.b32.xlu2 %v3862_v38, %s2884_s0  ;;  %4139 = vst [vmem:[#allocation19_spill] sm:$0xff] %v3895_v55 }
 0xc22   :  { %v1931_v43 = vpop.f32.mrf.mxu2 }
 0xc26   :  { %2330 = vrot.lane.b32.xlu1 %v3872_v49, %s2884_s0  ;;  %2042 = vrot.lane.b32.xlu0 %v3870_v3, %s2884_s0  ;;  %v1739_v49 = vpop.f32.mrf.mxu1 }
 0xc27   :  { %2044 = vrot.lane.b32.xlu2 %v3874_v57, %s2884_s0 }
 0xc28   :  { %v2021_v23 = vpop.permute.xlu0 %2020 }
 0xc29   :  { %v2068_v13 = vadd.f32 %v2021_v23, %v3716_v47  ;;  %v1623_v23 = vld [vmem:[#allocation5 + $0x238] sm:$0xff] }
 0xc2a   :  { %v3908_v33 = vmul.f32 %v1931_v43, %v1623_v23  ;;  %v1624_v23 = vld [vmem:[#allocation5 + $0x240] sm:$0xff] }
 0xc2b   :  { %v3889_v17 = vadd.f32 %v2068_v13, %v3885_v21  ;;  %v1801_v13 = vpop.f32.mrf.mxu3 }
 0xc2c   :  { %4141 = vst [vmem:[#allocation21_spill] sm:$0xff] %v3908_v33 }
 0xc2d   :  { %4136 = vst [vmem:[#allocation16_spill] sm:$0xff] %v3889_v17  ;;  %v1586_v17 = vld [vmem:[#allocation5 + $0x110] sm:$0xff] }
 0xc2e   :  { %2140 = vrot.lane.b32.xlu1 %v3893_v37, %s2884_s0  ;;  %2236 = vrot.lane.b32.xlu0 %v3891_v48, %s2884_s0  ;;  %v1958_v2 = vmul.f32 %v3758_v36, %v1586_v17  ;;  %v1869_v48 = vpop.f32.mrf.mxu0  ;;  %v1627_v36 = vld [vmem:[#allocation5 + $0x258] sm:$0xff]  ;;  %v1934_v17 = vpop.f32.mrf.mxu2 }
 0xc2f   :  { %2238 = vrot.lane.b32.xlu2 %v3895_v55, %s2884_s0 }
 0xc30   :  { %v2029_v47 = vpop.permute.xlu2 %2028 }
 0xc31   :  { %v2072_v22 = vadd.f32 %v2029_v47, %v3756_v30  ;;  %v1949_v47 = vmul.f32 %v3742_v24, %v1577_v16  ;;  %v1625_v16 = vld [vmem:[#allocation5 + $0x248] sm:$0xff] }
 0xc33   :  { %v2088_v30 = vadd.f32 %v2072_v22, %v3766_v52  ;;  %v3926_v52 = vmul.f32 %v1739_v49, %v1624_v23  ;;  %v3928_v22 = vmul.f32 %v1869_v48, %v1626_v4  ;;  %v3937_v4 = vmul.f32 %v1934_v17, %v1627_v36  ;;  %v1595_v23 = vld [vmem:[#allocation5 + $0x158] sm:$0xff]  ;;  %v1630_v17 = vld [vmem:[#allocation5 + $0x270] sm:$0xff] }
 0xc36   :  { %2332 = vrot.lane.b32.xlu0 %v3904_v25, %s2884_s0  ;;  %2046 = vrot.lane.b32.xlu1 %v3906_v28, %s2884_s0 }
 0xc37   :  { %2334 = vrot.lane.b32.xlu2 %v3908_v33, %s2884_s0  ;;  %v3924_v33 = vmul.f32 %v1801_v13, %v1621_v15  ;;  %v1742_v13 = vpop.f32.mrf.mxu1 }
 0xc38   :  { %v2025_v11 = vpop.permute.xlu1 %2024  ;;  %v2125_v35 = vpop.permute.xlu2 %2124 }
 0xc39   :  { %v2070_v43 = vadd.f32 %v2025_v11, %v3736_v58  ;;  %v2168_v25 = vadd.f32 %v2125_v35, %v2088_v30  ;;  %v1804_v58 = vpop.f32.mrf.mxu3  ;;  %v1582_v11 = vld [vmem:[#allocation5 + $0xf0] sm:$0xff] }
 0xc3a   :  { %v3941_v30 = vmul.f32 %v1804_v58, %v1625_v16  ;;  %v3954_v16 = vmul.f32 %v3788_v62, %v1595_v23 }
 0xc3b   :  { %v3920_v55 = vadd.f32 %v2168_v25, %v1958_v2  ;;  %v3922_v37 = vadd.f32 %v2070_v43, %v1949_v47  ;;  %v1628_v25 = vld [vmem:[#allocation5 + $0x260] sm:$0xff]  ;;  %v1629_v43 = vld [vmem:[#allocation5 + $0x268] sm:$0xff] }
 0xc3c   :  { %v3939_v48 = vmul.f32 %v1742_v13, %v1628_v25  ;;  %v1872_v25 = vpop.f32.mrf.mxu0 }
 0xc3d   :  { %4142 = vst [vmem:[#allocation22_spill] sm:$0xff] %v3920_v55  ;;  %v3958_v55 = vmul.f32 %v1872_v25, %v1630_v17 }
 0xc3e   :  { %4143 = vst [vmem:[#allocation23_spill] sm:$0xff] %v3922_v37  ;;  %2142 = vrot.lane.b32.xlu1 %v3924_v33, %s2884_s0  ;;  %2048 = vrot.lane.b32.xlu0 %v3926_v52, %s2884_s0 }
 0xc3f   :  { %2240 = vrot.lane.b32.xlu2 %v3928_v22, %s2884_s0 }
 0xc40   :  { %v2027_v24 = vpop.permute.xlu0 %2026 }
 0xc41   :  { %v2071_v49 = vadd.f32 %v2027_v24, %v3746_v1  ;;  %v1954_v1 = vmul.f32 %v3748_v27, %v1582_v11  ;;  %v1807_v24 = vpop.f32.mrf.mxu3 }
 0xc42   :  { %v3956_v37 = vmul.f32 %v1807_v24, %v1629_v43  ;;  %v1573_v24 = vld [vmem:[#allocation5 + $0xa8] sm:$0xff] }
 0xc43   :  { %v2087_v35 = vadd.f32 %v2071_v49, %v3754_v32  ;;  %v1631_v32 = vld [vmem:[#allocation5 + $0x278] sm:$0xff]  ;;  %v1937_v49 = vpop.f32.mrf.mxu2 }
 0xc46   :  { %2336 = vrot.lane.b32.xlu1 %v3937_v4, %s2884_s0  ;;  %2050 = vrot.lane.b32.xlu0 %v3939_v48, %s2884_s0 }
 0xc47   :  { %2144 = vrot.lane.b32.xlu2 %v3941_v30, %s2884_s0 }
 0xc48   :  { %v2123_v15 = vpop.permute.xlu0 %2122 }
 0xc49   :  { %v2167_v58 = vadd.f32 %v2123_v15, %v2087_v35  ;;  %v2035_v36 = vpop.permute.xlu2 %2034  ;;  %v3966_v35 = vmul.f32 %v1937_v49, %v1631_v32  ;;  %v3976_v49 = vmul.f32 %v3732_v19, %v1573_v24  ;;  %v1587_v19 = vld [vmem:[#allocation5 + $0x118] sm:$0xff] }
 0xc4a   :  { %v2075_v62 = vadd.f32 %v2035_v36, %v3790_v56 }
 0xc4b   :  { %v3951_v13 = vadd.f32 %v2167_v58, %v1954_v1  ;;  %v1591_v58 = vld [vmem:[#allocation5 + $0x138] sm:$0xff] }
 0xc4c   :  { %v2091_v43 = vadd.f32 %v2075_v62, %v3814_v9  ;;  %v1963_v56 = vmul.f32 %v3774_v53, %v1591_v58  ;;  %v1578_v53 = vld [vmem:[#allocation5 + $0xd0] sm:$0xff] }
 0xc4e   :  { %2146 = vrot.lane.b32.xlu1 %v3956_v37, %s2884_s0  ;;  %2320 = vrot.lane.b32.xlu0 %v3954_v16, %s2884_s0 }
 0xc4f   :  { %2242 = vrot.lane.b32.xlu2 %v3958_v55, %s2884_s0 }
 0xc50   :  { %v2031_v27 = vpop.permute.xlu1 %2030 }
 0xc51   :  { %v2227_v11 = vpop.permute.xlu2 %2226  ;;  %v2073_v32 = vadd.f32 %v2031_v27, %v3768_v41 }
 0xc53   :  { %v2089_v9 = vadd.f32 %v2073_v32, %v3784_v63 }
 0xc56   :  { %2120 = vrot.lane.b32.xlu1 %v1949_v47, %s2884_s0  ;;  %2338 = vrot.lane.b32.xlu0 %v3966_v35, %s2884_s0 }
 0xc57   :  { %2220 = vrot.lane.b32.xlu2 %v1958_v2, %s2884_s0 }
 0xc58   :  { %v2223_v15 = vpop.permute.xlu1 %2222  ;;  %v2033_v23 = vpop.permute.xlu0 %2032 }
 0xc59   :  { %v2131_v17 = vpop.permute.xlu2 %2130 }
 0xc5a   :  { %v2171_v25 = vadd.f32 %v2131_v17, %v2091_v43  ;;  %v1574_v17 = vld [vmem:[#allocation5 + $0xb0] sm:$0xff] }
 0xc5c   :  { %v2187_v47 = vadd.f32 %v2171_v25, %v3802_v60  ;;  %v2074_v60 = vadd.f32 %v2033_v23, %v3778_v54  ;;  %v1570_v23 = vld [vmem:[#allocation5 + $0x90] sm:$0xff] }
 0xc5e   :  { %2118 = vrot.lane.b32.xlu1 %v3976_v49, %s2884_s0  ;;  %2318 = vrot.lane.b32.xlu0 %v1963_v56, %s2884_s0  ;;  %v2267_v2 = vadd.f32 %v2227_v11, %v2187_v47  ;;  %v3991_v11 = vmul.f32 %v3764_v40, %v1587_v19  ;;  %v2090_v54 = vadd.f32 %v2074_v60, %v3798_v31 }
 0xc5f   :  { %2218 = vrot.lane.b32.xlu2 %v1954_v1, %s2884_s0  ;;  %v3994_v1 = vmul.f32 %v3738_v59, %v1578_v53  ;;  %v4010_v47 = vmul.f32 %v3728_v44, %v1574_v17  ;;  %v1571_v44 = vld [vmem:[#allocation5 + $0x98] sm:$0xff] }
 0xc60   :  { %v2127_v36 = vpop.permute.xlu1 %2126  ;;  %v2225_v62 = vpop.permute.xlu0 %2224  ;;  %v2283_v41 = vadd.f32 %v2267_v2, %v3826_v12 }
 0xc61   :  { %v2169_v27 = vadd.f32 %v2127_v36, %v2089_v9  ;;  %v2323_v43 = vpop.permute.xlu2 %2322  ;;  %v1579_v9 = vld [vmem:[#allocation5 + $0xd8] sm:$0xff] }
 0xc62   :  { %v3986_v24 = vadd.f32 %v2323_v43, %v2283_v41  ;;  %v4026_v41 = vmul.f32 %v3724_v45, %v1571_v44  ;;  %v4029_v19 = vmul.f32 %v3744_v61, %v1579_v9 }
 0xc63   :  { %v2185_v58 = vadd.f32 %v2169_v27, %v3776_v18 }
 0xc65   :  { %v2265_v63 = vadd.f32 %v2223_v15, %v2185_v58  ;;  %v1583_v15 = vld [vmem:[#allocation5 + $0xf8] sm:$0xff] }
 0xc66   :  { %2116 = vrot.lane.b32.xlu1 %v3885_v21, %s2884_s0  ;;  %2316 = vrot.lane.b32.xlu0 %v3991_v11, %s2884_s0  ;;  %v4007_v21 = vmul.f32 %v3718_v50, %v1570_v23  ;;  %v4013_v2 = vmul.f32 %v3752_v6, %v1583_v15  ;;  %v1575_v6 = vld [vmem:[#allocation5 + $0xb8] sm:$0xff] }
 0xc67   :  { %2216 = vrot.lane.b32.xlu2 %v3994_v1, %s2884_s0  ;;  %v4003_v12 = vadd.f32 %v2265_v63, %v1963_v56  ;;  %v4032_v27 = vmul.f32 %v3734_v46, %v1575_v6 }
 0xc68   :  { %v2129_v18 = vpop.permute.xlu0 %2128  ;;  %v2037_v40 = vpop.permute.xlu1 %2036 }
 0xc69   :  { %v2170_v59 = vadd.f32 %v2129_v18, %v2090_v54  ;;  %v2233_v25 = vpop.permute.xlu2 %2232 }
 0xc6b   :  { %v2186_v32 = vadd.f32 %v2170_v59, %v3786_v5 }
 0xc6d   :  { %v2266_v31 = vadd.f32 %v2225_v62, %v2186_v32  ;;  %v2076_v62 = vadd.f32 %v2037_v40, %v3800_v34 }
 0xc6e   :  { %2214 = vrot.lane.b32.xlu1 %v4010_v47, %s2884_s0  ;;  %2212 = vrot.lane.b32.xlu0 %v4007_v21, %s2884_s0 }
 0xc6f   :  { %2314 = vrot.lane.b32.xlu2 %v4013_v2, %s2884_s0  ;;  %v4022_v5 = vadd.f32 %v2266_v31, %v3954_v16  ;;  %v2092_v34 = vadd.f32 %v2076_v62, %v3822_v10 }
 0xc70   :  { %v2229_v50 = vpop.permute.xlu1 %2228  ;;  %v2039_v56 = vpop.permute.xlu0 %2038 }
 0xc71   :  { %v2137_v36 = vpop.permute.xlu2 %2136  ;;  %v2077_v61 = vadd.f32 %v2039_v56, %v3812_v7 }
 0xc73   :  { %v2093_v63 = vadd.f32 %v2077_v61, %v3836_v20 }
 0xc76   :  { %2312 = vrot.lane.b32.xlu1 %v4029_v19, %s2884_s0  ;;  %2308 = vrot.lane.b32.xlu0 %v4026_v41, %s2884_s0 }
 0xc77   :  { %2310 = vrot.lane.b32.xlu2 %v4032_v27, %s2884_s0 }
 0xc78   :  { %v2133_v16 = vpop.permute.xlu1 %2132  ;;  %v2231_v45 = vpop.permute.xlu0 %2230 }
 0xc79   :  { %v2329_v43 = vpop.permute.xlu2 %2328  ;;  %v2172_v53 = vadd.f32 %v2133_v16, %v2092_v34 }
 0xc7b   :  { %v2188_v46 = vadd.f32 %v2172_v53, %v3810_v0 }
 0xc7d   :  { %v2268_v60 = vadd.f32 %v2229_v50, %v2188_v46 }
 0xc7f   :  { %v2284_v58 = vadd.f32 %v2268_v60, %v3834_v51 }
 0xc80   :  { %v2325_v54 = vpop.permute.xlu1 %2324  ;;  %v2135_v18 = vpop.permute.xlu0 %2134 }
 0xc81   :  { %v4045_v40 = vadd.f32 %v2325_v54, %v2284_v58  ;;  %v2173_v23 = vadd.f32 %v2135_v18, %v2093_v63  ;;  %v2045_v17 = vpop.permute.xlu2 %2044 }
 0xc83   :  { %v2189_v10 = vadd.f32 %v2173_v23, %v3824_v42 }
 0xc85   :  { %v2269_v59 = vadd.f32 %v2231_v45, %v2189_v10 }
 0xc87   :  { %v2285_v15 = vadd.f32 %v2269_v59, %v3846_v14 }
 0xc88   :  { %v2235_v32 = vpop.permute.xlu1 %2234  ;;  %v2327_v7 = vpop.permute.xlu0 %2326 }
 0xc89   :  { %v4049_v31 = vadd.f32 %v2327_v7, %v2285_v15  ;;  %v2239_v0 = vpop.permute.xlu2 %2238  ;;  %v4144_v7 = vld [vmem:[#allocation18_spill] sm:$0xff] }
 0xc90   :  { %v2139_v50 = vpop.permute.xlu1 %2138  ;;  %v2041_v51 = vpop.permute.xlu0 %2040 }
 0xc91   :  { %v2078_v20 = vadd.f32 %v2041_v51, %v3858_v39  ;;  %v2335_v6 = vpop.permute.xlu2 %2334 }
 0xc93   :  { %v2094_v56 = vadd.f32 %v2078_v20, %v3850_v26 }
 0xc95   :  { %v2174_v44 = vadd.f32 %v2137_v36, %v2094_v56 }
 0xc97   :  { %v2190_v9 = vadd.f32 %v2174_v44, %v3838_v29 }
 0xc98   :  { %v2331_v42 = vpop.permute.xlu1 %2330  ;;  %v2043_v62 = vpop.permute.xlu0 %2042 }
 0xc99   :  { %v2270_v34 = vadd.f32 %v2233_v25, %v2190_v9  ;;  %v2241_v61 = vpop.permute.xlu2 %2240 }
 0xc9b   :  { %v2286_v14 = vadd.f32 %v2270_v34, %v3862_v38  ;;  %v2080_v38 = vadd.f32 %v2045_v17, %v3874_v57 }
 0xc9d   :  { %v2366_v16 = vadd.f32 %v2329_v43, %v2286_v14  ;;  %v2079_v43 = vadd.f32 %v2043_v62, %v3870_v3  ;;  %v4145_v3 = vld [vmem:[#allocation19_spill] sm:$0xff]  ;;  %v4146_v62 = vld [vmem:[#allocation17_spill] sm:$0xff] }
 0xc9e   :  { %v4147_v14 = vld [vmem:[#allocation13_spill] sm:$0xff] }
 0xc9f   :  { %v2095_v15 = vadd.f32 %v2079_v43, %v3860_v8  ;;  %v4149_v43 = vld [vmem:[#allocation20_spill] sm:$0xff] }
 0xca0   :  { %v2141_v45 = vpop.permute.xlu1 %2140  ;;  %v2237_v53 = vpop.permute.xlu0 %2236 }
 0xca1   :  { %v2145_v58 = vpop.permute.xlu2 %2144  ;;  %v2175_v17 = vadd.f32 %v2139_v50, %v2095_v15  ;;  %v4151_v15 = vld [vmem:[#allocation12_spill] sm:$0xff] }
 0xca8   :  { %v2333_v46 = vpop.permute.xlu0 %2332  ;;  %v2047_v60 = vpop.permute.xlu1 %2046 }
 0xca9   :  { %v2243_v36 = vpop.permute.xlu2 %2242  ;;  %v2081_v29 = vadd.f32 %v2047_v60, %v3906_v28  ;;  %v2191_v60 = vadd.f32 %v2175_v17, %v4147_v14 }
 0xcab   :  { %v2097_v23 = vadd.f32 %v2081_v29, %v3924_v33  ;;  %v4148_v29 = vld [vmem:[#allocation21_spill] sm:$0xff] }
 0xcb0   :  { %v2143_v63 = vpop.permute.xlu1 %2142  ;;  %v2049_v39 = vpop.permute.xlu0 %2048 }
 0xcb1   :  { %v2082_v26 = vadd.f32 %v2049_v39, %v3926_v52  ;;  %v2096_v52 = vadd.f32 %v2080_v38, %v4144_v7  ;;  %v2177_v51 = vadd.f32 %v2143_v63, %v2097_v23  ;;  %v2221_v28 = vpop.permute.xlu2 %2220 }
 0xcb3   :  { %v2098_v54 = vadd.f32 %v2082_v26, %v3941_v30  ;;  %v2176_v20 = vadd.f32 %v2141_v45, %v2096_v52  ;;  %v2193_v9 = vadd.f32 %v2177_v51, %v4145_v3  ;;  %v4153_v51 = vld [vmem:[#allocation22_spill] sm:$0xff] }
 0xcb5   :  { %v2178_v10 = vadd.f32 %v2145_v58, %v2098_v54  ;;  %v2192_v34 = vadd.f32 %v2176_v20, %v4146_v62  ;;  %v2273_v58 = vadd.f32 %v2239_v0, %v2193_v9  ;;  %v4150_v0 = vld [vmem:[#allocation14_spill] sm:$0xff]  ;;  %v4155_v9 = vld [vmem:[#allocation16_spill] sm:$0xff] }
 0xcb7   :  { %v2194_v30 = vadd.f32 %v2178_v10, %v3928_v22  ;;  %v2272_v63 = vadd.f32 %v2237_v53, %v2192_v34  ;;  %v2289_v54 = vadd.f32 %v2273_v58, %v4148_v29  ;;  %v2748_v29 = vld [vmem:[#allocation7 + $0xf7] ss:$0 sm:$0xff] }
 0xcb8   :  { %v2337_v18 = vpop.permute.xlu1 %2336  ;;  %v2051_v25 = vpop.permute.xlu0 %2050 }
 0xcb9   :  { %v2083_v59 = vadd.f32 %v2051_v25, %v3939_v48  ;;  %v2274_v48 = vadd.f32 %v2241_v61, %v2194_v30  ;;  %v2271_v25 = vadd.f32 %v2235_v32, %v2191_v60  ;;  %v2219_v38 = vpop.permute.xlu2 %2218  ;;  %v2288_v61 = vadd.f32 %v2272_v63, %v4149_v43  ;;  %v4152_v32 = vld [vmem:[#allocation15_spill] sm:$0xff] }
 0xcba   :  { %v2069_v7 = vadd.f32 %v4152_v32, %v4151_v15  ;;  %v4154_v30 = vld [vmem:[#allocation23_spill] sm:$0xff] }
 0xcbb   :  { %v2099_v56 = vadd.f32 %v2083_v59, %v3956_v37  ;;  %v2290_v22 = vadd.f32 %v2274_v48, %v3937_v4  ;;  %v2368_v53 = vadd.f32 %v2333_v46, %v2288_v61  ;;  %v2263_v46 = vadd.f32 %v2219_v38, %v3951_v13  ;;  %v2408_v63 = vld [vmem:[#allocation7 + $0xc8] sm:$0xff] }
 0xcbd   :  { %v2370_v23 = vadd.f32 %v2337_v18, %v2290_v22  ;;  %v2405_v22 = vld [vmem:[#allocation7 + $0xb0] sm:$0xff] }
 0xcc0   :  { %v2147_v44 = vpop.permute.xlu1 %2146  ;;  %v2321_v57 = vpop.permute.xlu0 %2320 }
 0xcc1   :  { %v2179_v33 = vadd.f32 %v2147_v44, %v2099_v56  ;;  %v2217_v59 = vpop.permute.xlu2 %2216  ;;  %v2362_v20 = vadd.f32 %v2321_v57, %v4022_v5  ;;  %v2085_v56 = vadd.f32 %v2069_v7, %v3976_v49  ;;  %v2750_v7 = vld [vmem:[#allocation7 + $0xf9] ss:$0 sm:$0xff] }
 0xcc3   :  { %v2195_v8 = vadd.f32 %v2179_v33, %v3958_v55  ;;  %v2369_v55 = vadd.f32 %v2335_v6, %v2289_v54  ;;  %v2264_v6 = vadd.f32 %v2221_v28, %v4153_v51  ;;  %v2279_v28 = vadd.f32 %v2263_v46, %v4013_v2 }
 0xcc5   :  { %v2275_v45 = vadd.f32 %v2243_v36, %v2195_v8  ;;  %v2287_v36 = vadd.f32 %v2271_v25, %v4150_v0  ;;  %v2444_v0 = vld [vmem:[#allocation7 + $0xd8] sm:$0xff] }
 0xcc7   :  { %v2291_v37 = vadd.f32 %v2275_v45, %v3966_v35  ;;  %v2367_v35 = vadd.f32 %v2331_v42, %v2287_v36  ;;  %v2372_v45 = vld [vmem:[#allocation7 + $0x80] sm:$0xff]  ;;  %v2443_v36 = vld [vmem:[#allocation7 + $0xd0] sm:$0xff] }
 0xcc8   :  { %v2121_v39 = vpop.permute.xlu1 %2120  ;;  %v2339_v26 = vpop.permute.xlu0 %2338 }
 0xcc9   :  { %v2371_v50 = vadd.f32 %v2339_v26, %v2291_v37  ;;  %v2166_v42 = vadd.f32 %v2121_v39, %v4154_v30  ;;  %v2315_v17 = vpop.permute.xlu2 %2314  ;;  %v2404_v37 = vld [vmem:[#allocation7 + $0xa8] sm:$0xff]  ;;  %v2402_v39 = vld [vmem:[#allocation7 + $0x98] sm:$0xff]  ;;  %v2401_v26 = vld [vmem:[#allocation7 + $0x90] sm:$0xff] }
 0xcca   :  { %v2359_v3 = vadd.f32 %v2315_v17, %v2279_v28 }
 0xccb   :  { %2376 = vmatpush.msrb.mxu3 %v2371_v50  ;;  %v2446_v50 = vld [vmem:[#allocation7 + $0xe8] sm:$0xff] }
 0xccc   :  { %2467 = vmatpush.msrb.mxu1 %v2446_v50 }
 0xccd   :  { %2377 = vmatpush.msrb.mxu3 %v2370_v23 }
 0xccf   :  { %2378 = vmatpush.msrb.mxu3 %v2369_v55  ;;  %v2445_v55 = vld [vmem:[#allocation7 + $0xe0] sm:$0xff] }
 0xcd0   :  { %v2119_v4 = vpop.permute.xlu1 %2118  ;;  %v2319_v10 = vpop.permute.xlu0 %2318  ;;  %2468 = vmatpush.msrb.mxu1 %v2445_v55 }
 0xcd1   :  { %2379 = vmatpush.msrb.mxu3 %v2368_v53  ;;  %v2361_v44 = vadd.f32 %v2319_v10, %v4003_v12  ;;  %v2311_v8 = vpop.permute.xlu2 %2310  ;;  %v2749_v53 = vld [vmem:[#allocation7 + $0xf8] ss:$0 sm:$0xff] }
 0xcd2   :  { %2469 = vmatpush.msrb.mxu1 %v2444_v0 }
 0xcd3   :  { %2380 = vmatpush.msrb.mxu3 %v2367_v35 }
 0xcd4   :  { %2470 = vmatpush.msrb.mxu1 %v2443_v36 }
 0xcd5   :  { %2381 = vmatpush.msrb.mxu3 %v2366_v16  ;;  %v2165_v16 = vadd.f32 %v2119_v4, %v2085_v56 }
 0xcd7   :  { %2382 = vmatpush.msrb.mxu3 %v4049_v31  ;;  %v2280_v31 = vadd.f32 %v2264_v6, %v3991_v11 }
 0xcd8   :  { %v2117_v18 = vpop.permute.xlu1 %2116  ;;  %v2317_v52 = vpop.permute.xlu0 %2316 }
 0xcd9   :  { %2383 = vmatpush.msrb.mxu3 %v4045_v40  ;;  %v2182_v40 = vadd.f32 %v2166_v42, %v3994_v1  ;;  %v2360_v13 = vadd.f32 %v2317_v52, %v2280_v31  ;;  %v2164_v49 = vadd.f32 %v2117_v18, %v4155_v9 }
 0xcdb   :  { %2384 = vmatpush.msrb.mxu3 %v3986_v24  ;;  %v2181_v24 = vadd.f32 %v2165_v16, %v4010_v47  ;;  %v2262_v12 = vadd.f32 %v2217_v59, %v2182_v40  ;;  %v2180_v11 = vadd.f32 %v2164_v49, %v4007_v21  ;;  %v2407_v21 = vld [vmem:[#allocation7 + $0xc0] sm:$0xff] }
 0xcdd   :  { %2385 = vmatpush.msrb.mxu3 %v2362_v20  ;;  %v2278_v1 = vadd.f32 %v2262_v12, %v4029_v19  ;;  %v2373_v19 = vld [vmem:[#allocation7 + $0x88] sm:$0xff] }
 0xcdf   :  { %2386 = vmatpush.msrb.mxu3 %v2361_v44 }
 0xce0   :  { %v2215_v5 = vpop.permute.xlu1 %2214  ;;  %v2213_v57 = vpop.permute.xlu0 %2212 }
 0xce1   :  { %2387 = vmatpush.msrb.mxu3 %v2360_v13  ;;  %v2261_v33 = vadd.f32 %v2215_v5, %v2181_v24  ;;  %v2260_v2 = vadd.f32 %v2213_v57, %v2180_v11 }
 0xce3   :  { %2388 = vmatpush.msrb.mxu3 %v2359_v3  ;;  %v2277_v62 = vadd.f32 %v2261_v33, %v4032_v27  ;;  %v2276_v60 = vadd.f32 %v2260_v2, %v4026_v41  ;;  %v2406_v27 = vld [vmem:[#allocation7 + $0xb8] sm:$0xff]  ;;  %v2403_v41 = vld [vmem:[#allocation7 + $0xa0] sm:$0xff] }
 0xce5   :  { %v2357_v58 = vadd.f32 %v2311_v8, %v2277_v62 }
 0xce8   :  { %v2313_v34 = vpop.permute.xlu1 %2312  ;;  %v2309_v14 = vpop.permute.xlu0 %2308 }
 0xce9   :  { %v2358_v48 = vadd.f32 %v2313_v34, %v2278_v1  ;;  %v2356_v47 = vadd.f32 %v2309_v14, %v2276_v60 }
 0xceb   :  { %2389 = vmatpush.msrb.mxu3 %v2358_v48 }
 0xced   :  { %2390 = vmatpush.msrb.mxu3 %v2357_v58 }
 0xcef   :  { %2391 = vmatpush.msrb.mxu3 %v2356_v47 }
 0xcf0   :  { %2392 = vmatmul.f32.vlgmr.msrb.gmra.mxu3 %v2372_v45 }
 0xcf1   :  { %2426 = vmatpush.msra.mxu3 %v2408_v63 }
 0xcf3   :  { %2427 = vmatpush.msra.mxu3 %v2407_v21 }
 0xcf5   :  { %2428 = vmatpush.msra.mxu3 %v2406_v27 }
 0xcf7   :  { %2429 = vmatpush.msra.mxu3 %v2405_v22 }
 0xcf8   :  { %2395 = vmatmul.f32.gmra.mxu3 %v2373_v19 }
 0xcf9   :  { %2430 = vmatpush.msra.mxu3 %v2404_v37 }
 0xcfb   :  { %2431 = vmatpush.msra.mxu3 %v2403_v41 }
 0xcfd   :  { %2432 = vmatpush.msra.mxu3 %v2402_v39 }
 0xcff   :  { %2433 = vmatpush.msra.mxu3 %v2401_v26 }
 0xd73   :  { %v2393_v54 = vpop.f32.mrf.mxu3 }
 0xd74   :  { %v2394_v25 = vadd.f32 %v2748_v29, %v2393_v54 }
 0xd76   :  { %v2399_v38 = vmax.f32 %v2394_v25, 0.0 }
 0xd78   :  { %2720 = vmatmul.msk.f32.vlgmr.msra.gmra.mxu3 %vm2411_vm1, %v2399_v38 }
 0xd7b   :  { %v2396_v43 = vpop.f32.mrf.mxu3 }
 0xd7c   :  { %v2397_v61 = vadd.f32 %v2748_v29, %v2396_v43 }
 0xd7e   :  { %v2400_v23 = vmax.f32 %v2397_v61, 0.0 }
 0xd80   :  { %2721 = vmatmul.msk.f32.gmra.mxu3 %vm2411_vm1, %v2400_v23 }
 0xdfb   :  { %v2435_v4 = vpop.f32.mrf.mxu3 }
 0xdfc   :  { %v2436_v10 = vadd.f32 %v2749_v53, %v2435_v4 }
 0xdfe   :  { %v2441_v35 = vmax.f32 %v2436_v10, 0.0 }
 0xe00   :  { %2722 = vmatmul.msk.f32.vlgmr.msrb.gmra.mxu1 %vm101_vm0, %v2441_v35 }
 0xe03   :  { %v2438_v59 = vpop.f32.mrf.mxu3 }
 0xe04   :  { %v2439_v15 = vadd.f32 %v2749_v53, %v2438_v59 }
 0xe06   :  { %v2442_v32 = vmax.f32 %v2439_v15, 0.0 }
 0xe08   :  { %2723 = vmatmul.msk.f32.gmra.mxu1 %vm101_vm0, %v2442_v32 }
 0xe7d   :  { %v2472_v18 = vpop.f32.mrf.mxu1 }
 0xe7e   :  { %v2473_v52 = vadd.f32 %v2750_v7, %v2472_v18 }
 0xe80   :  { %2478 = vmax.xlane.f32.xlu1 %v2473_v52 }
 0xe85   :  { %v2475_v51 = vpop.f32.mrf.mxu1 }
 0xe86   :  { %v2476_v6 = vadd.f32 %v2750_v7, %v2475_v51 }
 0xe88   :  { %2480 = vmax.xlane.f32.xlu2 %v2476_v6 }
 0xef3   :  { %v2479_v46 = vpop.xlane.xlu1 %2478 }
 0xef4   :  { %v2482_v20 = vsub.f32 %v2473_v52, %v2479_v46 }
 0xef6   :  { %v2484_v30 = vmul.f32 1.442695, %v2482_v20 }
 0xef8   :  { %2751 = vpow2.f32 %v2484_v30 }
 0xefb   :  { %v2481_v42 = vpop.xlane.xlu2 %2480 }
 0xefc   :  { %v2483_v56 = vsub.f32 %v2476_v6, %v2481_v42 }
 0xefe   :  { %v2752_v16 = vpop.eup %2751  ;;  %v2486_v44 = vmul.f32 1.442695, %v2483_v56 }
 0xeff   :  { %2488 = vadd.xlane.f32.xlu0 %v2752_v16 }
 0xf00   :  { %2753 = vpow2.f32 %v2486_v44 }
 0xf06   :  { %v2754_v31 = vpop.eup %2753 }
 0xf07   :  { %2490 = vadd.xlane.f32.xlu2 %v2754_v31 }
 0xf72   :  { %v2489_v17 = vpop.xlane.xlu0 %2488 }
 0xf73   :  { %2755 = vrcp.f32 %v2489_v17  ;;  %v2503_v57 = vand.u32 2147483648, %v2489_v17  ;;  %v2501_v9 = vand.u32 2147483647, %v2489_v17  ;;  %vm2497_vm3 = vweird.f32 %v2489_v17 }
 0xf75   :  { %v2504_v33 = vor.u32 1.1754944e-38, %v2503_v57  ;;  %vm2502_vm5 = vcmp.eq.f32.partialorder %v2501_v9, 8.507059e+37 }
 0xf79   :  { %v2756_v28 = vpop.eup %2755 }
 0xf7a   :  { %v2493_v40 = vmul.f32 %v2756_v28, %v2489_v17  ;;  %v2491_v13 = vpop.xlane.xlu2 %2490  ;;  %vm2498_vm2 = vweird.f32 %v2756_v28 }
 0xf7b   :  { %2757 = vrcp.f32 %v2491_v13  ;;  %vm2499_vm4 = vmor %vm2497_vm3, %vm2498_vm2  ;;  %v2518_v34 = vand.u32 2147483648, %v2491_v13  ;;  %v2516_v8 = vand.u32 2147483647, %v2491_v13  ;;  %vm2512_vm7 = vweird.f32 %v2491_v13 }
 0xf7c   :  { %v2494_v5 = vsub.f32 1.0, %v2493_v40 }
 0xf7d   :  { %v2519_v60 = vor.u32 1.1754944e-38, %v2518_v34  ;;  %vm2517_vm9 = vcmp.eq.f32.partialorder %v2516_v8, 8.507059e+37 }
 0xf7e   :  { %v2495_v3 = vmul.f32 %v2756_v28, %v2494_v5 }
 0xf80   :  { %v2496_v49 = vadd.f32 %v2756_v28, %v2495_v3 }
 0xf81   :  { %v2758_v24 = vpop.eup %2757 }
 0xf82   :  { %v2500_v12 = vsel %vm2499_vm4, %v2756_v28, %v2496_v49  ;;  %v2508_v11 = vmul.f32 %v2758_v24, %v2491_v13  ;;  %vm2513_vm6 = vweird.f32 %v2758_v24 }
 0xf83   :  { %v2505_v62 = vsel %vm2502_vm5, %v2504_v33, %v2500_v12  ;;  %vm2514_vm8 = vmor %vm2512_vm7, %vm2513_vm6 }
 0xf84   :  { %v2509_v2 = vsub.f32 1.0, %v2508_v11  ;;  %v2506_v1 = vmul.f32 %v2752_v16, %v2505_v62 }
 0xf86   :  { %v2510_v48 = vmul.f32 %v2758_v24, %v2509_v2  ;;  %2522 = vst [vmem:[#allocation8] sm:$0xff] %v2506_v1 }
 0xf88   :  { %v2511_v14 = vadd.f32 %v2758_v24, %v2510_v48 }
 0xf8a   :  { %v2515_v58 = vsel %vm2514_vm8, %v2758_v24, %v2511_v14 }
 0xf8b   :  { %v2520_v47 = vsel %vm2517_vm9, %v2519_v60, %v2515_v58 }
 0xf8c   :  { %v2521_v45 = vmul.f32 %v2754_v31, %v2520_v47 }
 0xf8e   :  { %2523 = vst [vmem:[#allocation8 + $0x8] sm:$0xff] %v2521_v45 }
 0xf8f   :  { %2536 = dma.vmem_to_hbm [thread:$0]  %s2529_s11, 256, %s2531_s14, [#allocation4], %s2881_s27, %s2881_s27, %s2882_s28  }
 0xf90   :  { %2875 = dma.done.wait [#allocation4], 256  }
 0xf91   :  { %2876 = vsyncadd [#allocation4], 4294967040 }
 0xf92   :  { %2541 = vsyncpa [#allocation3], 1 }
 0xf93   :  { %2542 = vsyncpa [#allocation6], 1 }
 0xf94   :  { %2543 = vsyncpa [#allocation4], 1 }

</bundles_post_ra>
